<compile_context>
chip_gen: v6e
topology: v6e:2x2x1
jax: 0.10.0
libtpu: 0.0.40
codegen_flags: <defaults>
</compile_context>

<pallas_src>
import functools

import jax
import jax.numpy as jnp
from jax import lax
from jax.experimental import pallas as pl
from jax.experimental.pallas import tpu as pltpu


def _fold_bn(gamma, beta, mean, var, eps):
    """Fold eval-mode BN into per-channel (C, 1) scale/bias columns."""
    scale = gamma / jnp.sqrt(var + eps)
    bias = beta - mean * scale
    return (scale.reshape(-1, 1).astype(jnp.float32),
            bias.reshape(-1, 1).astype(jnp.float32))


def _inverted_residual_kernel(
    x_ref,            # (1, Cin, HW)  f32
    w_exp_ref,        # (Cmid, Cin)   matmul dtype
    s1_ref, b1_ref,   # (Cmid, 1)     f32
    w_dw_ref,         # (Cmid, 9)     f32
    s2_ref, b2_ref,   # (Cmid, 1)     f32
    w_pj_ref,         # (Cout, Cmid)  matmul dtype
    s3_ref, b3_ref,   # (Cout, 1)     f32
    mask_ref,         # (2, HW)       f32  [left-valid, right-valid] column masks
    *rest,            # [sel_ref (HW, HWout)] iff stride>1, then o_ref (1, Cout, HWout)
    stride, expand, shortcut, W,
):
    if stride > 1:
        sel_ref, o_ref = rest
    else:
        (o_ref,) = rest

    cmid = w_dw_ref.shape[0]
    hw = x_ref.shape[2]

    x = x_ref[0]                                            # (Cin, HW) f32

    # --- 1x1 expand conv (MXU) + BN + ReLU6 (skipped when expand_ratio == 1) ---
    if expand:
        h = jnp.dot(w_exp_ref[...], x.astype(w_exp_ref.dtype),
                    preferred_element_type=jnp.float32)     # (Cmid, HW)
        h = jnp.clip(h * s1_ref[...] + b1_ref[...], 0.0, 6.0)
    else:
        h = x

    # --- 3x3 depthwise conv (pad=1), evaluated at every stride-1 position ---
    # Zero-extend along the lane axis (register resident, 128-aligned concat) so
    # row over/underflow reads zeros; column wrap is killed by the masks.
    pad_lanes = ((W + 1 + 127) // 128) * 128
    zpad = jnp.zeros((cmid, pad_lanes), jnp.float32)
    hp = jnp.concatenate([zpad, h, zpad], axis=1)           # (Cmid, HW + 2*pad)

    left_ok = mask_ref[0:1, :]                              # (1, HW): j >= 1
    right_ok = mask_ref[1:2, :]                             # (1, HW): j <= W-2

    acc = jnp.zeros((cmid, hw), jnp.float32)
    for ki in range(3):
        for kj in range(3):
            di, dj = ki - 1, kj - 1
            start = pad_lanes + di * W + dj                 # static lane shift
            win = lax.slice(hp, (0, start), (cmid, start + hw))
            if dj == -1:
                win = win * left_ok
            elif dj == 1:
                win = win * right_ok
            t = ki * 3 + kj
            acc = acc + win * w_dw_ref[:, t:t + 1]          # (Cmid,1) lane-bcast
    h2 = jnp.clip(acc * s2_ref[...] + b2_ref[...], 0.0, 6.0)

    # --- stride>1: subsample output positions with a 0/1 selection matmul ---
    if stride > 1:
        h2 = jnp.dot(h2.astype(sel_ref.dtype), sel_ref[...],
                     preferred_element_type=jnp.float32)    # (Cmid, HWout)

    # --- 1x1 projection conv (MXU) + BN (no activation), lane-dense output ---
    out = jnp.dot(w_pj_ref[...], h2.astype(w_pj_ref.dtype),
                  preferred_element_type=jnp.float32)       # (Cout, HWout)
    out = out * s3_ref[...] + b3_ref[...]

    if shortcut:
        out = out + x                                       # Cin==Cout, HW==HWout

    o_ref[0] = out.astype(o_ref.dtype)


def inverted_residual(x_nchw, params, *, stride, expand_ratio,
                      matmul_dtype=jnp.bfloat16):
    """x_nchw: (N, Cin, H, W) float32.  Returns (N, Cout, Hout, Wout) float32."""
    x = x_nchw.astype(jnp.float32)
    N, Cin, H, W = x.shape
    HW = H * W
    expand = expand_ratio != 1
    Cmid = int(round(Cin * expand_ratio))
    Cout = params["w_pj"].shape[0]
    shortcut = (stride == 1) and (Cin == Cout)
    Hout = (H + 2 - 3) // stride + 1
    Wout = (W + 2 - 3) // stride + 1
    HWout = Hout * Wout

    # NCHW with spatial flattened onto the lane-dense last axis: free reshape.
    x_flat = x.reshape(N, Cin, HW)

    # Fold eval-mode BatchNorm into per-channel scale/bias columns.
    s1, b1 = _fold_bn(*params["bn1"], eps=1e-3)   # Conv2dAct eps=0.001
    s2, b2 = _fold_bn(*params["bn2"], eps=1e-3)   # Conv2dAct eps=0.001
    s3, b3 = _fold_bn(*params["bn3"], eps=1e-5)   # bare nn.BatchNorm2d default

    w_exp = params["w_exp"].astype(matmul_dtype)              # (Cmid, Cin)
    w_dw = params["w_dw"].reshape(Cmid, 9).astype(jnp.float32)
    w_pj = params["w_pj"].astype(matmul_dtype)                # (Cout, Cmid)

    # Column-boundary masks for the flattened-spatial depthwise taps.
    j = jnp.arange(HW, dtype=jnp.int32) % W
    edge_mask = jnp.stack([(j >= 1), (j <= W - 2)], axis=0).astype(jnp.float32)

    inputs = [x_flat, w_exp, s1, b1, w_dw, s2, b2, w_pj, s3, b3, edge_mask]
    in_specs = [
        pl.BlockSpec((1, Cin, HW), lambda n: (n, 0, 0)),
        pl.BlockSpec((Cmid, Cin), lambda n: (0, 0)),
        pl.BlockSpec((Cmid, 1), lambda n: (0, 0)),
        pl.BlockSpec((Cmid, 1), lambda n: (0, 0)),
        pl.BlockSpec((Cmid, 9), lambda n: (0, 0)),
        pl.BlockSpec((Cmid, 1), lambda n: (0, 0)),
        pl.BlockSpec((Cmid, 1), lambda n: (0, 0)),
        pl.BlockSpec((Cout, Cmid), lambda n: (0, 0)),
        pl.BlockSpec((Cout, 1), lambda n: (0, 0)),
        pl.BlockSpec((Cout, 1), lambda n: (0, 0)),
        pl.BlockSpec((2, HW), lambda n: (0, 0)),
    ]
    if stride > 1:
        # 0/1 selection matrix mapping all HW positions -> strided output grid.
        q = jnp.arange(HWout, dtype=jnp.int32)
        p = stride * (q // Wout) * W + stride * (q % Wout)
        sel = (jnp.arange(HW, dtype=jnp.int32)[:, None] == p[None, :])
        inputs.append(sel.astype(matmul_dtype))               # (HW, HWout)
        in_specs.append(pl.BlockSpec((HW, HWout), lambda n: (0, 0)))

    kernel = functools.partial(
        _inverted_residual_kernel,
        stride=stride, expand=expand, shortcut=shortcut, W=W)

    # VMEM budget: double-buffered per-image I/O + resident weights + an
    # estimate of live in-kernel temporaries, capped at 48 MiB so the same
    # setting is safe on v7x (64 MiB physical) as well as v5e/v6e (128 MiB).
    per_step = 4 * (Cin * HW + Cout * HWout)
    consts = sum(int(a.size) * a.dtype.itemsize for a in inputs[1:])
    temps = 4 * 8 * Cmid * HW
    vmem_limit = int(min(max(2 * (per_step + consts) + temps + (4 << 20),
                             16 << 20), 48 << 20))

    out_flat = pl.pallas_call(
        kernel,
        out_shape=jax.ShapeDtypeStruct((N, Cout, HWout), jnp.float32),
        grid_spec=pltpu.PrefetchScalarGridSpec(
            num_scalar_prefetch=0,
            grid=(N,),
            in_specs=in_specs,
            out_specs=pl.BlockSpec((1, Cout, HWout), lambda n: (n, 0, 0)),
        ),
        compiler_params=pltpu.CompilerParams(
            dimension_semantics=("parallel",),
            vmem_limit_bytes=vmem_limit),
    )(*inputs)

    return out_flat.reshape(N, Cout, Hout, Wout)   # free reshape back to NCHW


def _reference(x, params, *, stride, expand_ratio):
    """Pure-JAX (XLA conv) reference of the same eval-mode forward."""
    N, Cin, H, W = x.shape
    Cmid = int(round(Cin * expand_ratio))
    Cout = params["w_pj"].shape[0]
    shortcut = (stride == 1) and (Cin == Cout)

    def bn(h, stats, eps):
        gamma, beta, mean, var = stats
        s = (1, -1, 1, 1)
        return ((h - mean.reshape(s)) *
                (gamma.reshape(s) / jnp.sqrt(var.reshape(s) + eps)) +
                beta.reshape(s))

    h = x
    if expand_ratio != 1:
        h = lax.conv_general_dilated(
            h, params["w_exp"][:, :, None, None], (1, 1), "VALID",
            dimension_numbers=("NCHW", "OIHW", "NCHW"))
        h = jnp.clip(bn(h, params["bn1"], 1e-3), 0.0, 6.0)
    h = lax.conv_general_dilated(
        h, params["w_dw"][:, None, :, :], (stride, stride), ((1, 1), (1, 1)),
        dimension_numbers=("NCHW", "OIHW", "NCHW"), feature_group_count=Cmid)
    h = jnp.clip(bn(h, params["bn2"], 1e-3), 0.0, 6.0)
    h = lax.conv_general_dilated(
        h, params["w_pj"][:, :, None, None], (1, 1), "VALID",
        dimension_numbers=("NCHW", "OIHW", "NCHW"))
    h = bn(h, params["bn3"], 1e-5)
    return x + h if shortcut else h


def _init_params(key, cin, cout, expand_ratio):
    cmid = int(round(cin * expand_ratio))
    ks = jax.random.split(key, 6)

    def bn(k, c):
        k0, k1, k2, k3 = jax.random.split(k, 4)
        gamma = 0.5 + jax.random.uniform(k0, (c,), jnp.float32)
        beta = 0.1 * jax.random.normal(k1, (c,), jnp.float32)
        mean = 0.1 * jax.random.normal(k2, (c,), jnp.float32)
        var = 0.5 + jax.random.uniform(k3, (c,), jnp.float32)
        return gamma, beta, mean, var

    return {
        "w_exp": 0.2 * jax.random.normal(ks[0], (cmid, cin), jnp.float32),
        "bn1": bn(ks[1], cmid),
        "w_dw": 0.2 * jax.random.normal(ks[2], (cmid, 3, 3), jnp.float32),
        "bn2": bn(ks[3], cmid),
        "w_pj": 0.2 * jax.random.normal(ks[4], (cout, cmid), jnp.float32),
        "bn3": bn(ks[5], cout),
    }


if __name__ == "__main__":
    key = jax.random.PRNGKey(0)
    configs = [
        # (N, Cin, H, W, Cout, stride, expand_ratio)
        (2, 4, 16, 16, 4, 1, 6),   # expand + shortcut (main demo config)
        (2, 4, 16, 16, 8, 2, 6),   # expand + stride-2 downsample, no shortcut
        (2, 8, 16, 16, 8, 1, 1),   # expand_ratio == 1 (identity expand) + shortcut
    ]
    for idx, (N, Cin, H, W, Cout, stride, er) in enumerate(configs):
        kx, kp = jax.random.split(jax.random.fold_in(key, idx))
        x = jax.random.normal(kx, (N, Cin, H, W), jnp.float32)
        params = _init_params(kp, Cin, Cout, er)

        y = inverted_residual(x, params, stride=stride, expand_ratio=er)
        y = jax.block_until_ready(y)

        y_ref = _reference(x, params, stride=stride, expand_ratio=er)
        Hout = (H + 2 - 3) // stride + 1
        Wout = (W + 2 - 3) // stride + 1
        assert y.shape == (N, Cout, Hout, Wout), (idx, y.shape)
        # Tolerance accounts for bf16 MXU operands (f32 accumulation) vs f32 ref.
        assert jnp.allclose(y, y_ref, atol=2e-2, rtol=2e-2), \
            f"mismatch vs reference in config {idx}"

    print("KERNEL_OK")
</pallas_src>

<mosaic_0001>
module attributes {stable_mosaic.version = 11 : i64} {
  func.func @_inverted_residual_kernel(%arg0: i32, %arg1: memref<1x4x256xf32, #tpu.memory_space<vmem>>, %arg2: memref<24x4xbf16, #tpu.memory_space<vmem>>, %arg3: memref<24x1xf32, #tpu.memory_space<vmem>>, %arg4: memref<24x1xf32, #tpu.memory_space<vmem>>, %arg5: memref<24x9xf32, #tpu.memory_space<vmem>>, %arg6: memref<24x1xf32, #tpu.memory_space<vmem>>, %arg7: memref<24x1xf32, #tpu.memory_space<vmem>>, %arg8: memref<4x24xbf16, #tpu.memory_space<vmem>>, %arg9: memref<4x1xf32, #tpu.memory_space<vmem>>, %arg10: memref<4x1xf32, #tpu.memory_space<vmem>>, %arg11: memref<2x256xf32, #tpu.memory_space<vmem>>, %arg12: memref<1x4x256xf32, #tpu.memory_space<vmem>>) attributes {dimension_semantics = [#tpu.dimension_semantics<parallel>], iteration_bounds = array<i64: 2>, scalar_prefetch = 0 : i64, scratch_operands = 0 : i64, tpu.core_type = #tpu.core_type<tc>, window_params = [{transform_indices = @transform_0, window_bounds = array<i64: 1, 4, 256>}, {pipeline_mode = #tpu.pipeline_mode<synchronous>, transform_indices = @transform_1, window_bounds = array<i64: 24, 4>}, {pipeline_mode = #tpu.pipeline_mode<synchronous>, transform_indices = @transform_2, window_bounds = array<i64: 24, 1>}, {pipeline_mode = #tpu.pipeline_mode<synchronous>, transform_indices = @transform_3, window_bounds = array<i64: 24, 1>}, {pipeline_mode = #tpu.pipeline_mode<synchronous>, transform_indices = @transform_4, window_bounds = array<i64: 24, 9>}, {pipeline_mode = #tpu.pipeline_mode<synchronous>, transform_indices = @transform_5, window_bounds = array<i64: 24, 1>}, {pipeline_mode = #tpu.pipeline_mode<synchronous>, transform_indices = @transform_6, window_bounds = array<i64: 24, 1>}, {pipeline_mode = #tpu.pipeline_mode<synchronous>, transform_indices = @transform_7, window_bounds = array<i64: 4, 24>}, {pipeline_mode = #tpu.pipeline_mode<synchronous>, transform_indices = @transform_8, window_bounds = array<i64: 4, 1>}, {pipeline_mode = #tpu.pipeline_mode<synchronous>, transform_indices = @transform_9, window_bounds = array<i64: 4, 1>}, {pipeline_mode = #tpu.pipeline_mode<synchronous>, transform_indices = @transform_10, window_bounds = array<i64: 2, 256>}, {transform_indices = @transform_11, window_bounds = array<i64: 1, 4, 256>}]} {
    %c0 = arith.constant 0 : index
    %c0_0 = arith.constant 0 : index
    %c0_1 = arith.constant 0 : index
    %0 = vector.load %arg1[%c0, %c0_0, %c0_1] : memref<1x4x256xf32, #tpu.memory_space<vmem>>, vector<1x4x256xf32>
    %1 = vector.shape_cast %0 : vector<1x4x256xf32> to vector<4x256xf32>
    %c0_2 = arith.constant 0 : index
    %c0_3 = arith.constant 0 : index
    %2 = vector.load %arg2[%c0_2, %c0_3] : memref<24x4xbf16, #tpu.memory_space<vmem>>, vector<24x4xbf16>
    %3 = arith.truncf %1 : vector<4x256xf32> to vector<4x256xbf16>
    %cst = arith.constant dense<0.000000e+00> : vector<24x256xf32>
    %4 = tpu.matmul %2, %3, %cst {dimension_numbers = #tpu.dot_dimension_numbers<[1], [0], [0], [1], [0, 0, 1, 1], [], []>} : vector<24x4xbf16>, vector<4x256xbf16>, vector<24x256xf32> -> vector<24x256xf32>
    %c0_4 = arith.constant 0 : index
    %c0_5 = arith.constant 0 : index
    %5 = vector.load %arg3[%c0_4, %c0_5] : memref<24x1xf32, #tpu.memory_space<vmem>>, vector<24x1xf32>
    %6 = vector.broadcast %5 : vector<24x1xf32> to vector<24x256xf32>
    %7 = arith.mulf %4, %6 : vector<24x256xf32>
    %c0_6 = arith.constant 0 : index
    %c0_7 = arith.constant 0 : index
    %8 = vector.load %arg4[%c0_6, %c0_7] : memref<24x1xf32, #tpu.memory_space<vmem>>, vector<24x1xf32>
    %9 = vector.broadcast %8 : vector<24x1xf32> to vector<24x256xf32>
    %10 = arith.addf %7, %9 : vector<24x256xf32>
    %cst_8 = arith.constant 0.000000e+00 : f32
    %cst_9 = arith.constant 6.000000e+00 : f32
    %11 = vector.broadcast %cst_8 : f32 to vector<24x256xf32>
    %12 = arith.maximumf %11, %10 : vector<24x256xf32>
    %13 = vector.broadcast %cst_9 : f32 to vector<24x256xf32>
    %14 = arith.minimumf %13, %12 : vector<24x256xf32>
    %cst_10 = arith.constant 0.000000e+00 : f32
    %15 = vector.broadcast %cst_10 : f32 to vector<24x128xf32>
    %16 = tpu.concatenate %15, %14, %15 in 1 : vector<24x128xf32>, vector<24x256xf32>, vector<24x128xf32> -> vector<24x512xf32>
    %c0_11 = arith.constant 0 : index
    %c0_12 = arith.constant 0 : index
    %17 = vector.load %arg11[%c0_11, %c0_12] : memref<2x256xf32, #tpu.memory_space<vmem>>, vector<1x256xf32>
    %c1 = arith.constant 1 : index
    %c0_13 = arith.constant 0 : index
    %18 = vector.load %arg11[%c1, %c0_13] : memref<2x256xf32, #tpu.memory_space<vmem>>, vector<1x256xf32>
    %cst_14 = arith.constant 0.000000e+00 : f32
    %19 = vector.broadcast %cst_14 : f32 to vector<24x256xf32>
    %20 = vector.extract_strided_slice %16 {offsets = [0, 111], sizes = [24, 256], strides = [1, 1]} : vector<24x512xf32> to vector<24x256xf32>
    %21 = vector.broadcast %17 : vector<1x256xf32> to vector<24x256xf32>
    %22 = arith.mulf %20, %21 : vector<24x256xf32>
    %c0_15 = arith.constant 0 : index
    %c0_16 = arith.constant 0 : index
    %23 = vector.load %arg5[%c0_15, %c0_16] : memref<24x9xf32, #tpu.memory_space<vmem>>, vector<24x1xf32>
    %24 = vector.broadcast %23 : vector<24x1xf32> to vector<24x256xf32>
    %25 = arith.mulf %22, %24 : vector<24x256xf32>
    %26 = arith.addf %19, %25 : vector<24x256xf32>
    %27 = vector.extract_strided_slice %16 {offsets = [0, 112], sizes = [24, 256], strides = [1, 1]} : vector<24x512xf32> to vector<24x256xf32>
    %c0_17 = arith.constant 0 : index
    %c1_18 = arith.constant 1 : index
    %28 = vector.load %arg5[%c0_17, %c1_18] : memref<24x9xf32, #tpu.memory_space<vmem>>, vector<24x1xf32>
    %29 = vector.broadcast %28 : vector<24x1xf32> to vector<24x256xf32>
    %30 = arith.mulf %27, %29 : vector<24x256xf32>
    %31 = arith.addf %26, %30 : vector<24x256xf32>
    %32 = vector.extract_strided_slice %16 {offsets = [0, 113], sizes = [24, 256], strides = [1, 1]} : vector<24x512xf32> to vector<24x256xf32>
    %33 = vector.broadcast %18 : vector<1x256xf32> to vector<24x256xf32>
    %34 = arith.mulf %32, %33 : vector<24x256xf32>
    %c0_19 = arith.constant 0 : index
    %c2 = arith.constant 2 : index
    %35 = vector.load %arg5[%c0_19, %c2] : memref<24x9xf32, #tpu.memory_space<vmem>>, vector<24x1xf32>
    %36 = vector.broadcast %35 : vector<24x1xf32> to vector<24x256xf32>
    %37 = arith.mulf %34, %36 : vector<24x256xf32>
    %38 = arith.addf %31, %37 : vector<24x256xf32>
    %39 = vector.extract_strided_slice %16 {offsets = [0, 127], sizes = [24, 256], strides = [1, 1]} : vector<24x512xf32> to vector<24x256xf32>
    %40 = vector.broadcast %17 : vector<1x256xf32> to vector<24x256xf32>
    %41 = arith.mulf %39, %40 : vector<24x256xf32>
    %c0_20 = arith.constant 0 : index
    %c3 = arith.constant 3 : index
    %42 = vector.load %arg5[%c0_20, %c3] : memref<24x9xf32, #tpu.memory_space<vmem>>, vector<24x1xf32>
    %43 = vector.broadcast %42 : vector<24x1xf32> to vector<24x256xf32>
    %44 = arith.mulf %41, %43 : vector<24x256xf32>
    %45 = arith.addf %38, %44 : vector<24x256xf32>
    %46 = vector.extract_strided_slice %16 {offsets = [0, 128], sizes = [24, 256], strides = [1, 1]} : vector<24x512xf32> to vector<24x256xf32>
    %c0_21 = arith.constant 0 : index
    %c4 = arith.constant 4 : index
    %47 = vector.load %arg5[%c0_21, %c4] : memref<24x9xf32, #tpu.memory_space<vmem>>, vector<24x1xf32>
    %48 = vector.broadcast %47 : vector<24x1xf32> to vector<24x256xf32>
    %49 = arith.mulf %46, %48 : vector<24x256xf32>
    %50 = arith.addf %45, %49 : vector<24x256xf32>
    %51 = vector.extract_strided_slice %16 {offsets = [0, 129], sizes = [24, 256], strides = [1, 1]} : vector<24x512xf32> to vector<24x256xf32>
    %52 = vector.broadcast %18 : vector<1x256xf32> to vector<24x256xf32>
    %53 = arith.mulf %51, %52 : vector<24x256xf32>
    %c0_22 = arith.constant 0 : index
    %c5 = arith.constant 5 : index
    %54 = vector.load %arg5[%c0_22, %c5] : memref<24x9xf32, #tpu.memory_space<vmem>>, vector<24x1xf32>
    %55 = vector.broadcast %54 : vector<24x1xf32> to vector<24x256xf32>
    %56 = arith.mulf %53, %55 : vector<24x256xf32>
    %57 = arith.addf %50, %56 : vector<24x256xf32>
    %58 = vector.extract_strided_slice %16 {offsets = [0, 143], sizes = [24, 256], strides = [1, 1]} : vector<24x512xf32> to vector<24x256xf32>
    %59 = vector.broadcast %17 : vector<1x256xf32> to vector<24x256xf32>
    %60 = arith.mulf %58, %59 : vector<24x256xf32>
    %c0_23 = arith.constant 0 : index
    %c6 = arith.constant 6 : index
    %61 = vector.load %arg5[%c0_23, %c6] : memref<24x9xf32, #tpu.memory_space<vmem>>, vector<24x1xf32>
    %62 = vector.broadcast %61 : vector<24x1xf32> to vector<24x256xf32>
    %63 = arith.mulf %60, %62 : vector<24x256xf32>
    %64 = arith.addf %57, %63 : vector<24x256xf32>
    %65 = vector.extract_strided_slice %16 {offsets = [0, 144], sizes = [24, 256], strides = [1, 1]} : vector<24x512xf32> to vector<24x256xf32>
    %c0_24 = arith.constant 0 : index
    %c7 = arith.constant 7 : index
    %66 = vector.load %arg5[%c0_24, %c7] : memref<24x9xf32, #tpu.memory_space<vmem>>, vector<24x1xf32>
    %67 = vector.broadcast %66 : vector<24x1xf32> to vector<24x256xf32>
    %68 = arith.mulf %65, %67 : vector<24x256xf32>
    %69 = arith.addf %64, %68 : vector<24x256xf32>
    %70 = vector.extract_strided_slice %16 {offsets = [0, 145], sizes = [24, 256], strides = [1, 1]} : vector<24x512xf32> to vector<24x256xf32>
    %71 = vector.broadcast %18 : vector<1x256xf32> to vector<24x256xf32>
    %72 = arith.mulf %70, %71 : vector<24x256xf32>
    %c0_25 = arith.constant 0 : index
    %c8 = arith.constant 8 : index
    %73 = vector.load %arg5[%c0_25, %c8] : memref<24x9xf32, #tpu.memory_space<vmem>>, vector<24x1xf32>
    %74 = vector.broadcast %73 : vector<24x1xf32> to vector<24x256xf32>
    %75 = arith.mulf %72, %74 : vector<24x256xf32>
    %76 = arith.addf %69, %75 : vector<24x256xf32>
    %c0_26 = arith.constant 0 : index
    %c0_27 = arith.constant 0 : index
    %77 = vector.load %arg6[%c0_26, %c0_27] : memref<24x1xf32, #tpu.memory_space<vmem>>, vector<24x1xf32>
    %78 = vector.broadcast %77 : vector<24x1xf32> to vector<24x256xf32>
    %79 = arith.mulf %76, %78 : vector<24x256xf32>
    %c0_28 = arith.constant 0 : index
    %c0_29 = arith.constant 0 : index
    %80 = vector.load %arg7[%c0_28, %c0_29] : memref<24x1xf32, #tpu.memory_space<vmem>>, vector<24x1xf32>
    %81 = vector.broadcast %80 : vector<24x1xf32> to vector<24x256xf32>
    %82 = arith.addf %79, %81 : vector<24x256xf32>
    %cst_30 = arith.constant 0.000000e+00 : f32
    %cst_31 = arith.constant 6.000000e+00 : f32
    %83 = vector.broadcast %cst_30 : f32 to vector<24x256xf32>
    %84 = arith.maximumf %83, %82 : vector<24x256xf32>
    %85 = vector.broadcast %cst_31 : f32 to vector<24x256xf32>
    %86 = arith.minimumf %85, %84 : vector<24x256xf32>
    %c0_32 = arith.constant 0 : index
    %c0_33 = arith.constant 0 : index
    %87 = vector.load %arg8[%c0_32, %c0_33] : memref<4x24xbf16, #tpu.memory_space<vmem>>, vector<4x24xbf16>
    %88 = arith.truncf %86 : vector<24x256xf32> to vector<24x256xbf16>
    %cst_34 = arith.constant dense<0.000000e+00> : vector<4x256xf32>
    %89 = tpu.matmul %87, %88, %cst_34 {dimension_numbers = #tpu.dot_dimension_numbers<[1], [0], [0], [1], [0, 0, 1, 1], [], []>} : vector<4x24xbf16>, vector<24x256xbf16>, vector<4x256xf32> -> vector<4x256xf32>
    %c0_35 = arith.constant 0 : index
    %c0_36 = arith.constant 0 : index
    %90 = vector.load %arg9[%c0_35, %c0_36] : memref<4x1xf32, #tpu.memory_space<vmem>>, vector<4x1xf32>
    %91 = vector.broadcast %90 : vector<4x1xf32> to vector<4x256xf32>
    %92 = arith.mulf %89, %91 : vector<4x256xf32>
    %c0_37 = arith.constant 0 : index
    %c0_38 = arith.constant 0 : index
    %93 = vector.load %arg10[%c0_37, %c0_38] : memref<4x1xf32, #tpu.memory_space<vmem>>, vector<4x1xf32>
    %94 = vector.broadcast %93 : vector<4x1xf32> to vector<4x256xf32>
    %95 = arith.addf %92, %94 : vector<4x256xf32>
    %96 = arith.addf %95, %1 : vector<4x256xf32>
    %c0_39 = arith.constant 0 : index
    %c0_40 = arith.constant 0 : index
    %c0_41 = arith.constant 0 : index
    %97 = vector.load %arg12[%c0_39, %c0_40, %c0_41] : memref<1x4x256xf32, #tpu.memory_space<vmem>>, vector<1x4x256xf32>
    %98 = vector.shape_cast %97 : vector<1x4x256xf32> to vector<4x256xf32>
    %99 = vector.shape_cast %96 : vector<4x256xf32> to vector<1x4x256xf32>
    tpu.vector_store %arg12[%c0_39, %c0_40, %c0_41], %99 {strides = array<i32>} : memref<1x4x256xf32, #tpu.memory_space<vmem>>, vector<1x4x256xf32>,
    return
  }
  func.func @transform_0(%arg0: i32) -> (i32, i32, i32) {
    %c0_i32 = arith.constant 0 : i32
    %c0_i32_0 = arith.constant 0 : i32
    %c0_i32_1 = arith.constant 0 : i32
    return %arg0, %c0_i32, %c0_i32_0 : i32, i32, i32
  }
  func.func @transform_1(%arg0: i32) -> (i32, i32) {
    %c0_i32 = arith.constant 0 : i32
    %c0_i32_0 = arith.constant 0 : i32
    %c0_i32_1 = arith.constant 0 : i32
    return %c0_i32, %c0_i32_0 : i32, i32
  }
  func.func @transform_2(%arg0: i32) -> (i32, i32) {
    %c0_i32 = arith.constant 0 : i32
    %c0_i32_0 = arith.constant 0 : i32
    %c0_i32_1 = arith.constant 0 : i32
    return %c0_i32, %c0_i32_0 : i32, i32
  }
  func.func @transform_3(%arg0: i32) -> (i32, i32) {
    %c0_i32 = arith.constant 0 : i32
    %c0_i32_0 = arith.constant 0 : i32
    %c0_i32_1 = arith.constant 0 : i32
    return %c0_i32, %c0_i32_0 : i32, i32
  }
  func.func @transform_4(%arg0: i32) -> (i32, i32) {
    %c0_i32 = arith.constant 0 : i32
    %c0_i32_0 = arith.constant 0 : i32
    %c0_i32_1 = arith.constant 0 : i32
    return %c0_i32, %c0_i32_0 : i32, i32
  }
  func.func @transform_5(%arg0: i32) -> (i32, i32) {
    %c0_i32 = arith.constant 0 : i32
    %c0_i32_0 = arith.constant 0 : i32
    %c0_i32_1 = arith.constant 0 : i32
    return %c0_i32, %c0_i32_0 : i32, i32
  }
  func.func @transform_6(%arg0: i32) -> (i32, i32) {
    %c0_i32 = arith.constant 0 : i32
    %c0_i32_0 = arith.constant 0 : i32
    %c0_i32_1 = arith.constant 0 : i32
    return %c0_i32, %c0_i32_0 : i32, i32
  }
  func.func @transform_7(%arg0: i32) -> (i32, i32) {
    %c0_i32 = arith.constant 0 : i32
    %c0_i32_0 = arith.constant 0 : i32
    %c0_i32_1 = arith.constant 0 : i32
    return %c0_i32, %c0_i32_0 : i32, i32
  }
  func.func @transform_8(%arg0: i32) -> (i32, i32) {
    %c0_i32 = arith.constant 0 : i32
    %c0_i32_0 = arith.constant 0 : i32
    %c0_i32_1 = arith.constant 0 : i32
    return %c0_i32, %c0_i32_0 : i32, i32
  }
  func.func @transform_9(%arg0: i32) -> (i32, i32) {
    %c0_i32 = arith.constant 0 : i32
    %c0_i32_0 = arith.constant 0 : i32
    %c0_i32_1 = arith.constant 0 : i32
    return %c0_i32, %c0_i32_0 : i32, i32
  }
  func.func @transform_10(%arg0: i32) -> (i32, i32) {
    %c0_i32 = arith.constant 0 : i32
    %c0_i32_0 = arith.constant 0 : i32
    %c0_i32_1 = arith.constant 0 : i32
    return %c0_i32, %c0_i32_0 : i32, i32
  }
  func.func @transform_11(%arg0: i32) -> (i32, i32, i32) {
    %c0_i32 = arith.constant 0 : i32
    %c0_i32_0 = arith.constant 0 : i32
    %c0_i32_1 = arith.constant 0 : i32
    return %arg0, %c0_i32, %c0_i32_0 : i32, i32, i32
  }
}

</mosaic_0001>

<bundles_post_ra>
// kernel: tpu_custom_call.1
= control target key start
LH: loop header
LB: loop body
LE: loop exit
PB: predicated region body
PF: predicated region fallthrough
CT: control target
= control target key end

     0   :  { %s2498_s0 = inlined_call_operand.vmem [shape: f32[2,4,256], index: 0, kind: input, shape index: {}]   ;;  %s2499_s1 = inlined_call_operand.vmem [shape: bf16[24,4], index: 1, kind: input, shape index: {}]   ;;  %s2500_s2 = inlined_call_operand.vmem [shape: f32[24,1], index: 2, kind: input, shape index: {}]   ;;  %s2501_s3 = inlined_call_operand.vmem [shape: f32[24,1], index: 3, kind: input, shape index: {}]   ;;  %s2502_s4 = inlined_call_operand.vmem [shape: f32[24,9], index: 4, kind: input, shape index: {}]   ;;  %s2503_s5 = inlined_call_operand.vmem [shape: f32[24,1], index: 5, kind: input, shape index: {}]   ;;  %s2504_s6 = inlined_call_operand.vmem [shape: f32[24,1], index: 6, kind: input, shape index: {}]   ;;  %s2505_s7 = inlined_call_operand.vmem [shape: bf16[4,24], index: 7, kind: input, shape index: {}]   ;;  %s2506_s8 = inlined_call_operand.vmem [shape: f32[4,1], index: 8, kind: input, shape index: {}]   ;;  %s2507_s9 = inlined_call_operand.vmem [shape: f32[4,1], index: 9, kind: input, shape index: {}]   ;;  %s2508_s10 = inlined_call_operand.vmem [shape: f32[2,256], index: 10, kind: input, shape index: {}]   ;;  %s2509_s11 = inlined_call_operand.hbm [shape: f32[2,4,256], index: 11, kind: output, shape index: {}]  }
   0x1   :  { %2516 = sst [smem:[#allocation5_spill]] %s2498_s0 }
   0x2   :  { %2517 = sst [smem:[#allocation6_spill]] %s2499_s1 }
   0x3   :  { %16 = vsyncpa [#allocation3], 0 }
   0x4   :  { %18 = vsyncpa [#allocation3 + $0x1], 0  ;;  %s1757_s17 = smov 0   ;;  %s1759_s18 = smov 0  }
   0x5   :  { %s1761_s19 = smov 0   ;;  %s1763_s20 = smov 0  }
   0x6 LB: > { %s1778_s21 = sadd.s32 4294967295, %s1673_s20   ;;  %s1501_s22 = sadd.s32 4294967294, %s1673_s20   ;;  %s1673_s20 = sphi %s1763_s20, %s2528_s20   ;;  %s1669_s19 = sphi %s1761_s19, %s2527_s19   ;;  %s1665_s18 = sphi %s1759_s18, %s2526_s18   ;;  %s1661_s17 = sphi %s1757_s17, %s2525_s17  }
   0x7   : > { %s1782_s23 = sadd.s32 1, %s1673_s20   ;;  %s267_s24 = sadd.s32 1, %s1669_s19 }
   0x8   : > { %s264_s25 = ssub.s32 %s1673_s20, %s1782_s23  ;;  %p277_p0 = scmp.ne.s32.totalorder %s1669_s19, %s1665_s18 }
   0x9   : > { %p265_p1 = scmp.eq.s32.totalorder %s264_s25, 0  ;;  %p278_p2 = scmp.eq.s32.totalorder %s1778_s21, 1 }
   0xa   : > { %p283_p3 = scmp.ne.s32.totalorder %s1665_s18, %s1661_s17  ;;  %p284_p4 = scmp.eq.s32.totalorder %s1501_s22, 1 }
   0xb   : > { %s1793_s26 = scalar_select %p265_p1, %s1669_s19, %s267_s24  }
   0xc   : > { %p1795_p5 = por %p278_p2, %p277_p0  ;;  %p1799_p6 = por %p284_p4, %p283_p3 }
   0xd   : > { %p1504_p7 = scmp.ge.s32.totalorder %s1673_s20, 1  ;;  %p340_p8 = scmp.lt.s32.totalorder %s1673_s20, 3 }
   0xf   : > { %p341_p9 = pnand %p1504_p7, %p340_p8 }
  0x10   : > { %p380_p10 = scmp.lt.s32.totalorder (!%p341_p9), %s1778_s21, 1  ;;  %s2520_s0 = sld [smem:[#allocation5_spill]] (!%p341_p9) }
  0x11   : > { %344 = sbr.rel (%p341_p9) target bundleno = 819 (0x333), region = 64  ;;  %s1677_s22 = smov (!%p341_p9), 113  }
  0x12   : > { %s2521_s1 = sld [smem:[#allocation6_spill]] (!%p341_p9)  ;;  %s2510_s15 = smov (!%p341_p9), 127  }
  0x13   : > { %s1682_s25 = smov (!%p341_p9), 1   ;;  %s1692_s12 = smov (!%p341_p9), 110  }
  0x14   : > { %s2514_s13 = smov (!%p341_p9), 96   ;;  %s2523_s16 = smov (!%p341_p9), 96  }
  0x15   : > { %s377_s24 = sand.u32 (!%p341_p9), 1, %s1665_s18  }
  0x16   : > { %v468_v0 = vld [vmem:[%s2500_s2] sm:$0xff]  ;;  %v1811_v1 = vld [vmem:[%s2502_s4 + $0x10] sm:$0xff]  ;;  %v532_v2 = vlaneseq  ;;  %v1675_v3 = vmov 0   ;;  %v1676_v4 = vmov 1   ;;  %v469_v5 = vld [vmem:[%s2500_s2 + $0x8] sm:$0xff]  ;;  %s381_s29 = scalar_select %p380_p10, %s1778_s21, 1 }
  0x17   : > { %1583 = vset.pattern.permute.xlu1 %v1675_v3  ;;  %1584 = vset.pattern.permute.xlu0 %v1676_v4  ;;  %v1822_v6 = vld [vmem:[%s2502_s4 + $0x8] sm:$0xff]  ;;  %v1513_v8 = vld [vmem:[%s2508_s10 + $0x1] ss:$2 sm:$0x3]  ;;  %vm410_vm0 = vcmask 1041408   ;;  %v1678_v17 = vmov 2  }
  0x18   : > { %473 = vperm.xlu1 %1583, %v468_v0   ;;  %601 = vperm.xlu0 %1584, %v1811_v1   ;;  %v533_v7 = vshrl.u32 %v532_v2, 7  ;;  %s1521_s30 = sshll.u32 %s381_s29, 3  ;;  %v493_v11 = vld [vmem:[%s2501_s3 + $0x8] sm:$0xff]  ;;  %v1850_v18 = vld [vmem:[%s2502_s4] sm:$0xff]  ;;  %vm403_vm1 = vcmask 31744   ;;  %v1680_v23 = vmov 3  }
  0x19   : > { %449 = vmatprep.mubr.bf16.mxu0 %v1675_v3  ;;  %1395 = vmatprep.mubr.bf16.mxu1 %v1675_v3  ;;  %s1836_s14 = scalar_lea.vmem %s2520_s0, %s1521_s30  ;;  %v528_v19 = vld [vmem:[%s2508_s10] ss:$2 sm:$0x3]  ;;  %v1611_v24 = vld [vmem:[%s2521_s1 + $0x8] ss:$0 sps:$4 sm:$0xff]   ;;  %v1681_v26 = vmov 4  }
  0x1a   : > { %v538_v9 = vsub.s32 1, %v533_v7  ;;  %v386_v12 = vld [vmem:[%s1836_s14] sm:$0xff]  ;;  %v534_v22 = vsub.s32 0, %v533_v7  ;;  %v1683_v27 = vmov 5   ;;  %v1685_v29 = vmov 6   ;;  %s2512_s29 = smov 17  }
  0x1b   : > { %v1842_v13 = vcombine.high %v386_v12, %v386_v12  ;;  %v393_v14 = vpack.c.bf16 %v386_v12, %v386_v12  ;;  %v1610_v20 = vld [vmem:[%s2521_s1] sm:$0xff]   ;;  %v1686_v30 = vmov 7   ;;  %v1688_v31 = vmov 8   ;;  %v470_v32 = vld [vmem:[%s2500_s2 + $0x10] sm:$0xff]  ;;  %s1691_s30 = smov 112  }
  0x1c   : > { %478 = vperm.xlu1 %1583, %v469_v5   ;;  %597 = vperm.xlu0 %1584, %v1822_v6   ;;  %v1831_v10 = vrot.slane %v1513_v8, %v538_v9  ;;  %v1859_v21 = vrot.slane %v528_v19, %v538_v9  ;;  %v669_v25 = vrot.slane %v1513_v8, %v534_v22  ;;  %v494_v33 = vld [vmem:[%s2501_s3 + $0x10] sm:$0xff]  ;;  %v492_v34 = vld [vmem:[%s2501_s3] sm:$0xff]  ;;  %vm1163_vm2 = vcmask 138240  }
  0x1d   : > { %v394_v15 = vpack.c.bf16 %v1842_v13, %v1842_v13  ;;  %v412_v16 = vsel %vm410_vm0, %v393_v14, 0  ;;  %v535_v28 = vrot.slane %v528_v19, %v534_v22  ;;  %v1250_v22 = vld [vmem:[%s2503_s5 + $0x10] sm:$0xff]  ;;  %vm678_vm3 = vcmask 924672  }
  0x1e   : > { %vm640_vm4 = vcmask 1039360   ;;  %vm544_vm5 = vcmask 908288   ;;  %vm912_vm6 = vcmask 7168   ;;  %vm1001_vm7 = vcmask 121856  }
  0x1f   : > { %1510 = vmatprep.subr.msk.bf16.mxu0 %vm410_vm0, %v394_v15  ;;  %vm738_vm8 = vcmask 1031168   ;;  %vm1134_vm9 = vcmask 777216   ;;  %vm826_vm10 = vcmask 916480   ;;  %vm972_vm11 = vcmask 900096  }
  0x20   : > { %502 = vperm.xlu1 %1583, %v493_v11   ;;  %676 = vrot.lane.b32.xlu0 %v1831_v10, %s1677_s22  ;;  %vm1061_vm12 = vcmask 785408   ;;  %vm1223_vm13 = vcmask 769024   ;;  %vm1356_vm14 = vcmask 1043456   ;;  %vm1352_vm15 = vcmask 195584  }
  0x21   : > { %1588 = vset.pattern.permute.xlu0 %v1678_v17  ;;  %432 = vmatpush1.bf16.msra.mxu0 %v412_v16 }
  0x24   : > { %1585 = vset.pattern.permute.xlu1 %v1678_v17  ;;  %691 = vperm.xlu0 %1588, %v1850_v18  }
  0x25   : > { %699 = vperm.xlu1 %1585, %v1811_v1   ;;  %1511 = vmatmul.mubr.msk.bf16.vlgmr.msra.gmra.mxu0 %vm403_vm1, %v1610_v20 }
  0x26   : > { %459 = vmatprep.mubr.bf16.mxu0 %v1675_v3 }
  0x28   : > { %765 = vrot.lane.b32.xlu0 %v1859_v21, %s2510_s15 }
  0x29   : > { %1586 = vset.pattern.permute.xlu1 %v1676_v4  ;;  %1591 = vset.pattern.permute.xlu0 %v1680_v23 }
  0x2a   : > { %593 = vperm.xlu1 %1586, %v1850_v18  }
  0x2c   : > { %779 = vperm.xlu0 %1591, %v1850_v18  }
  0x2d   : > { %1512 = vmatmul.mubr.msk.bf16.gmra.mxu0 %vm403_vm1, %v1611_v24 }
  0x2e   : > { %674 = vrot.lane.b32.xlu1 %v669_v25, %s1677_s22  ;;  %s1684_s22 = smov 15  }
  0x2f   : > { %1587 = vset.pattern.permute.xlu1 %v1680_v23 }
  0x30   : > { %1594 = vset.pattern.permute.xlu0 %v1681_v26 }
  0x31   : > { %852 = vperm.xlu0 %1594, %v1850_v18  }
  0x32   : > { %787 = vperm.xlu1 %1587, %v1811_v1  }
  0x35   : > { %910 = vrot.lane.b32.xlu0 %v1831_v10, %s1682_s25 }
  0x36   : > { %1589 = vset.pattern.permute.xlu1 %v1678_v17  ;;  %1597 = vset.pattern.permute.xlu0 %v1683_v27 }
  0x37   : > { %695 = vperm.xlu1 %1589, %v1822_v6  }
  0x39   : > { %925 = vperm.xlu0 %1597, %v1850_v18  }
  0x3b   : > { %763 = vrot.lane.b32.xlu1 %v535_v28, %s2510_s15  ;;  %s2522_s15 = smov 127  }
  0x3c   : > { %1590 = vset.pattern.permute.xlu1 %v1681_v26 }
  0x3d   : > { %999 = vrot.lane.b32.xlu0 %v1859_v21, %s1684_s22 }
  0x3e   : > { %1600 = vset.pattern.permute.xlu0 %v1685_v29 }
  0x3f   : > { %860 = vperm.xlu1 %1590, %v1811_v1  }
  0x41   : > { %1014 = vperm.xlu0 %1600, %v1850_v18  }
  0x43   : > { %1592 = vset.pattern.permute.xlu1 %v1680_v23 }
  0x44   : > { %783 = vperm.xlu1 %1592, %v1822_v6  }
  0x45   : > { %1603 = vset.pattern.permute.xlu0 %v1686_v30 }
  0x46   : > { %1087 = vperm.xlu0 %1603, %v1850_v18  }
  0x48   : > { %1593 = vset.pattern.permute.xlu1 %v1683_v27 }
  0x49   : > { %933 = vperm.xlu1 %1593, %v1811_v1  }
  0x4a   : > { %1161 = vrot.lane.b32.xlu0 %v1831_v10, %s2512_s29 }
  0x4b   : > { %1606 = vset.pattern.permute.xlu0 %v1688_v31 }
  0x4d   : > { %1595 = vset.pattern.permute.xlu1 %v1681_v26 }
  0x4e   : > { %856 = vperm.xlu1 %1595, %v1822_v6   ;;  %1180 = vperm.xlu0 %1606, %v1822_v6  }
  0x52   : > { %908 = vrot.lane.b32.xlu1 %v669_v25, %s1682_s25  ;;  %1607 = vset.pattern.permute.xlu0 %v1675_v3  ;;  %s1689_s25 = smov 111  }
  0x53   : > { %483 = vperm.xlu0 %1607, %v470_v32   ;;  %1596 = vset.pattern.permute.xlu1 %v1685_v29 }
  0x56   : > { %1022 = vperm.xlu1 %1596, %v1811_v1  }
  0x57   : > { %507 = vperm.xlu0 %1607, %v494_v33   ;;  %v1277_v33 = vld [vmem:[%s2504_s6 + $0x10] sm:$0xff] }
  0x5a   : > { %1598 = vset.pattern.permute.xlu1 %v1683_v27 }
  0x5b   : > { %929 = vperm.xlu1 %1598, %v1822_v6   ;;  %497 = vperm.xlu0 %1607, %v492_v34  }
  0x5f   : > { %997 = vrot.lane.b32.xlu1 %v535_v28, %s1684_s22  ;;  %542 = vrot.lane.b32.xlu0 %v1859_v21, %s1689_s25  ;;  %s1690_s22 = smov 126  }
  0x60   : > { %1599 = vset.pattern.permute.xlu1 %v1686_v30 }
  0x63   : > { %1095 = vperm.xlu1 %1599, %v1811_v1   ;;  %566 = vperm.xlu0 %1607, %v1822_v6  }
  0x67   : > { %1601 = vset.pattern.permute.xlu1 %v1685_v29 }
  0x68   : > { %1018 = vperm.xlu1 %1601, %v1822_v6  }
  0x6c   : > { %1602 = vset.pattern.permute.xlu1 %v1688_v31 }
  0x6d   : > { %1184 = vperm.xlu1 %1602, %v1811_v1  }
  0x71   : > { %1604 = vset.pattern.permute.xlu1 %v1686_v30 }
  0x72   : > { %1091 = vperm.xlu1 %1604, %v1822_v6  }
  0x76   : > { %1159 = vrot.lane.b32.xlu1 %v669_v25, %s2512_s29  ;;  %s1694_s29 = smov 95  }
  0x77   : > { %1605 = vset.pattern.permute.xlu1 %v1688_v31 }
  0x7a   : > { %1176 = vperm.xlu1 %1605, %v1850_v18  }
  0x7e   : > { %1608 = vset.pattern.permute.xlu1 %v1675_v3 }
  0x7f   : > { %571 = vperm.xlu1 %1608, %v1811_v1  }
  0x83   : > { %540 = vrot.lane.b32.xlu1 %v535_v28, %s1689_s25 }
  0x87   : > { %561 = vperm.xlu1 %1608, %v1850_v18  }
  0x93   : > { %v1917_v35 = vpop.permute.xlu1 %473  ;;  %v1919_v36 = vpop.permute.xlu0 %601 }
  0x94   : > { %v610_v37 = vmul.f32 0.0, %v1919_v36 }
  0x96   : > { %634 = vrot.lane.b32.xlu1 %v610_v37, %s2522_s15 }
  0x97   : > { %v1923_v38 = vpop.permute.xlu1 %478  ;;  %v1925_v39 = vpop.permute.xlu0 %597 }
  0x98   : > { %v607_v63 = vmul.f32 0.0, %v1925_v39 }
  0x9b   : > { %v1927_v40 = vpop.permute.xlu1 %502  ;;  %v1929_v41 = vpop.permute.xlu0 %676 }
  0x9f   : > { %v1931_v42 = vpop.permute.xlu0 %691 }
  0xa0   : > { %v1933_v43 = vpop.permute.xlu1 %699 }
  0xa3   : > { %v1935_v44 = vpop.permute.xlu0 %765 }
  0xa5   : > { %v1937_v45 = vpop.permute.xlu1 %593 }
  0xa6   : > { %v604_v52 = vmul.f32 0.0, %v1937_v45 }
  0xa7   : > { %v1939_v46 = vpop.permute.xlu0 %779 }
  0xa9   : > { %v1941_v47 = vpop.permute.xlu1 %674 }
  0xaa   : > { %v683_v48 = vmul.f32 0.0, %v1941_v47 }
  0xac   : > { %v708_v49 = vmul.f32 %v1933_v43, %v683_v48  ;;  %v1945_v50 = vpop.permute.xlu0 %852  ;;  %v702_v55 = vmul.f32 %v1931_v42, %v683_v48 }
  0xad   : > { %v1947_v51 = vpop.permute.xlu1 %787 }
  0xae   : > { %732 = vrot.lane.b32.xlu1 %v708_v49, %s1690_s22 }
  0xb0   : > { %v1951_v53 = vpop.permute.xlu0 %910 }
  0xb1   : > { %v919_v3 = vmul.f32 0.0, %v1951_v53 }
  0xb2   : > { %622 = vrot.lane.b32.xlu1 %v604_v52, %s2522_s15  ;;  %v1954_v54 = vpop.permute.xlu1 %695 }
  0xb3   : > { %v705_v2 = vmul.f32 %v1954_v54, %v683_v48 }
  0xb4   : > { %v1957_v56 = vpop.permute.xlu0 %925 }
  0xb5   : > { %v938_v15 = vmul.f32 %v1957_v56, %v919_v3 }
  0xb6   : > { %720 = vrot.lane.b32.xlu1 %v702_v55, %s1690_s22  ;;  %v1960_v57 = vpop.permute.xlu1 %763 }
  0xb7   : > { %v771_v58 = vmul.f32 0.0, %v1960_v57 }
  0xb8   : > { %v1963_v59 = vpop.permute.xlu0 %999 }
  0xb9   : > { %v796_v60 = vmul.f32 %v1947_v51, %v771_v58  ;;  %v790_v6 = vmul.f32 %v1939_v46, %v771_v58  ;;  %v1008_v16 = vmul.f32 0.0, %v1963_v59 }
  0xba   : > { %v1966_v61 = vpop.permute.xlu1 %860 }
  0xbb   : > { %820 = vrot.lane.b32.xlu0 %v796_v60, %s1691_s30 }
  0xbc   : > { %v1969_v62 = vpop.permute.xlu0 %1014 }
  0xbd   : > { %v1027_v28 = vmul.f32 %v1969_v62, %v1008_v16 }
  0xbf   : > { %628 = vrot.lane.b32.xlu0 %v607_v63, %s2522_s15  ;;  %v1973_v0 = vpop.permute.xlu1 %783 }
  0xc0   : > { %v793_v11 = vmul.f32 %v1973_v0, %v771_v58 }
  0xc1   : > { %v1975_v1 = vpop.permute.xlu0 %1087 }
  0xc3   : > { %726 = vrot.lane.b32.xlu0 %v705_v2, %s1690_s22 }
  0xc4   : > { %v1980_v4 = vpop.permute.xlu1 %933 }
  0xc5   : > { %v1982_v5 = vpop.permute.xlu0 %1161  ;;  %v944_v7 = vmul.f32 %v1980_v4, %v919_v3 }
  0xc6   : > { %v1987_v8 = vmul.f32 0.0, %v1982_v5 }
  0xc7   : > { %808 = vrot.lane.b32.xlu0 %v790_v6, %s1691_s30  ;;  %970 = vrot.lane.b32.xlu1 %v944_v7, %s1692_s12 }
  0xc9   : > { %v1991_v9 = vpop.permute.xlu1 %856  ;;  %v1993_v10 = vpop.permute.xlu0 %1180 }
  0xca   : > { %v1998_v12 = vmul.f32 %v1993_v10, %v1987_v8 }
  0xcb   : > { %814 = vrot.lane.b32.xlu1 %v793_v11, %s1691_s30 }
  0xcd   : > { %v2001_v14 = vpop.permute.xlu1 %908 }
  0xce   : > { %v484_v23 = vpop.permute.xlu0 %483 }
  0xcf   : > { %958 = vrot.lane.b32.xlu1 %v938_v15, %s1692_s12 }
  0xd1   : > { %v2006_v17 = vpop.permute.xlu1 %1022 }
  0xd2   : > { %v1033_v18 = vmul.f32 %v2006_v17, %v1008_v16  ;;  %v508_v26 = vpop.permute.xlu0 %507 }
  0xd4   : > { %1059 = vrot.lane.b32.xlu0 %v1033_v18, %s2514_s13 }
  0xd6   : > { %v2010_v19 = vpop.permute.xlu1 %929  ;;  %v498_v31 = vpop.permute.xlu0 %497 }
  0xd7   : > { %v941_v20 = vmul.f32 %v2010_v19, %v919_v3  ;;  %v1100_v3 = vmul.f32 0.0, %v1975_v1 }
  0xd9   : > { %964 = vrot.lane.b32.xlu0 %v941_v20, %s1692_s12 }
  0xda   : > { %v2014_v21 = vpop.permute.xlu1 %997 }
  0xdd   : > { %1263 = vperm.xlu0 %1607, %v1250_v22  }
  0xde   : > { %v2019_v24 = vpop.permute.xlu1 %1095 }
  0xdf   : > { %v1106_v25 = vmul.f32 0.0, %v2019_v24 }
  0xe1   : > { %1132 = vrot.lane.b32.xlu1 %v1106_v25, %s1694_s29 }
  0xe3   : > { %v2023_v27 = vpop.permute.xlu1 %1018 }
  0xe4   : > { %v1030_v29 = vmul.f32 %v2023_v27, %v1008_v16 }
  0xe5   : > { %1047 = vrot.lane.b32.xlu1 %v1027_v28, %s2514_s13  ;;  %v451_v30 = vpop.f32.mrf.mxu0 }
  0xe6   : > { %1053 = vrot.lane.b32.xlu0 %v1030_v29, %s2514_s13  ;;  %v486_v32 = vmul.f32 %v1917_v35, %v451_v30  ;;  %s1695_s13 = smov 94  }
  0xe7   : > { %v453_v34 = vpop.f32.mrf.mxu0 }
  0xe8   : > { %v2033_v37 = vpop.permute.xlu1 %1184  ;;  %v510_v48 = vadd.f32 %v498_v31, %v486_v32  ;;  %v487_v49 = vmul.f32 %v1917_v35, %v453_v34 }
  0xe9   : > { %v1195_v52 = vmul.f32 %v2033_v37, %v1987_v8  ;;  %v455_v55 = vpop.f32.mrf.mxu0 }
  0xea   : > { %1290 = vperm.xlu0 %1607, %v1277_v33   ;;  %v516_v58 = vmax.f32 %v510_v48, 0.0  ;;  %v511_v60 = vadd.f32 %v498_v31, %v487_v49  ;;  %v488_v63 = vmul.f32 %v1923_v38, %v455_v55  ;;  %v2067_v48 = vsel %vm678_vm3, %v1941_v47, %v1929_v41 }
  0xeb   : > { %1221 = vrot.lane.b32.xlu1 %v1195_v52, %s1695_s13  ;;  %v457_v2 = vpop.f32.mrf.mxu0 }
  0xec   : > { %v2041_v6 = vmin.f32 %v516_v58, 6.0  ;;  %v517_v7 = vmax.f32 %v511_v60, 0.0  ;;  %v489_v35 = vmul.f32 %v1923_v38, %v457_v2  ;;  %v512_v18 = vadd.f32 %v1927_v40, %v488_v63  ;;  %v543_v2 = vpop.permute.xlu0 %542 }
  0xed   : > { %v2044_v11 = vpop.permute.xlu1 %1091  ;;  %v461_v15 = vpop.f32.mrf.mxu0 }
  0xee   : > { %v513_v16 = vadd.f32 %v1927_v40, %v489_v35  ;;  %v605_v22 = vmul.f32 %v1937_v45, %v2041_v6  ;;  %v2051_v25 = vmin.f32 %v517_v7, 6.0  ;;  %v1098_v30 = vmul.f32 %v1975_v1, %v2041_v6 }
  0xef   : > { %1120 = vrot.lane.b32.xlu1 %v1100_v3, %s1694_s29  ;;  %v463_v20 = vpop.f32.mrf.mxu0  ;;  %v490_v31 = vmul.f32 %v484_v23, %v461_v15  ;;  %v518_v49 = vmax.f32 %v512_v18, 0.0  ;;  %v684_v47 = vmul.f32 %v2067_v48, %v2041_v6  ;;  %v2089_v15 = vsel %vm640_vm4, %v1960_v57, %v1935_v44 }
  0xf0   : > { %v519_v28 = vmax.f32 %v513_v16, 0.0  ;;  %v491_v29 = vmul.f32 %v484_v23, %v463_v20  ;;  %624 = vrot.lane.b32.xlu0 %v605_v22, %s2522_s15  ;;  %v863_v23 = vmul.f32 %v1945_v50, %v2041_v6  ;;  %v606_v63 = vmul.f32 %v1937_v45, %v2051_v25 }
  0xf1   : > { %v2053_v38 = vpop.permute.xlu1 %1159  ;;  %v465_v32 = vpop.f32.mrf.mxu0  ;;  %v514_v3 = vadd.f32 %v508_v26, %v490_v31  ;;  %v551_v35 = vmul.f32 %v543_v2, %v2051_v25  ;;  %v2091_v16 = vmin.f32 %v518_v49, 6.0  ;;  %v1099_v45 = vmul.f32 %v1975_v1, %v2051_v25 }
  0xf2   : > { %v1164_v40 = vsel %vm1163_vm2, %v2053_v38, %v1982_v5  ;;  %v2061_v33 = vmin.f32 %v519_v28, 6.0  ;;  %v515_v34 = vadd.f32 %v508_v26, %v491_v29  ;;  %v703_v18 = vmul.f32 %v1931_v42, %v684_v47 }
  0xf3   : > { %1116 = vrot.lane.b32.xlu1 %v1098_v30, %s1694_s29  ;;  %v2072_v52 = vmul.f32 %v1164_v40, %v2051_v25  ;;  %v466_v5 = vpop.f32.mrf.mxu0  ;;  %v772_v20 = vmul.f32 %v2089_v15, %v2041_v6  ;;  %v520_v22 = vmax.f32 %v514_v3, 0.0  ;;  %v608_v57 = vmul.f32 %v1925_v39, %v2091_v16 }
  0xf4   : > { %v521_v55 = vmax.f32 %v515_v34, 0.0  ;;  %v1172_v58 = vmul.f32 %v1164_v40, %v2061_v33  ;;  %875 = vrot.lane.b32.xlu0 %v863_v23, %s1689_s25  ;;  %v685_v1 = vmul.f32 %v1929_v41, %v2051_v25  ;;  %v773_v49 = vmul.f32 %v1935_v44, %v2051_v25 }
  0xf5   : > { %v2075_v60 = vpop.permute.xlu1 %1176  ;;  %v791_v30 = vmul.f32 %v1939_v46, %v772_v20  ;;  %v2108_v31 = vmin.f32 %v520_v22, 6.0  ;;  %v864_v3 = vmul.f32 %v1945_v50, %v2051_v25 }
  0xf6   : > { %v2082_v7 = vmin.f32 %v521_v55, 6.0 }
  0xf7   : > { %626 = vrot.lane.b32.xlu1 %v606_v63, %s2522_s15  ;;  %v704_v63 = vmul.f32 %v1931_v42, %v685_v1  ;;  %v792_v42 = vmul.f32 %v1939_v46, %v773_v49  ;;  %v1006_v1 = vmul.f32 %v2014_v21, %v2041_v6  ;;  %v567_v46 = vpop.permute.xlu0 %566 }
  0xf8   : > { %v555_v26 = vmul.f32 %v543_v2, %v2082_v7  ;;  %1118 = vrot.lane.b32.xlu0 %v1099_v45, %s1694_s29  ;;  %v917_v45 = vmul.f32 %v2001_v14, %v2041_v6 }
  0xfa   : > { %v572_v28 = vpop.permute.xlu1 %571  ;;  %v936_v50 = vmul.f32 %v1957_v56, %v917_v45  ;;  %v553_v45 = vmul.f32 %v543_v2, %v2061_v33 }
  0xfb   : > { %v2100_v29 = vmul.f32 %v572_v28, %v555_v26  ;;  %722 = vrot.lane.b32.xlu1 %v703_v18, %s1690_s22  ;;  %v1171_v18 = vmul.f32 %v2053_v38, %v2091_v16 }
  0xfc   : > { %630 = vrot.lane.b32.xlu0 %v608_v57, %s2522_s15 }
  0xfe   : > { %v541_v32 = vpop.permute.xlu1 %540 }
  0xff   : > { %v545_v34 = vsel %vm544_vm5, %v541_v32, %v543_v2  ;;  %810 = vrot.lane.b32.xlu1 %v791_v30, %s1691_s30  ;;  %v549_v47 = vmul.f32 0.0, %v541_v32  ;;  %v1174_v30 = vmul.f32 %v1164_v40, %v2082_v7  ;;  %v2145_v32 = vmul.f32 %v1993_v10, %v1171_v18 }
 0x100   : > { %v550_v23 = vmul.f32 %v545_v34, %v2041_v6  ;;  %v552_v5 = vmul.f32 %v545_v34, %v2091_v16  ;;  %v554_v55 = vmul.f32 %v545_v34, %v2108_v31  ;;  %724 = vrot.lane.b32.xlu0 %v704_v63, %s1690_s22  ;;  %v865_v34 = vmul.f32 %v1991_v9, %v2091_v16 }
 0x101   : > { %v2155_v40 = vmul.f32 %v1993_v10, %v1172_v58  ;;  %v2158_v63 = vmul.f32 %v567_v46, %v549_v47  ;;  %v2169_v18 = vmul.f32 %v572_v28, %v549_v47  ;;  %v609_v2 = vmul.f32 %v1925_v39, %v2061_v33 }
 0x102   : > { %v562_v26 = vpop.permute.xlu1 %561  ;;  %v2171_v10 = vmul.f32 %v572_v28, %v554_v55  ;;  %v1009_v55 = vmul.f32 %v2014_v21, %v2091_v16 }
 0x103   : > { %v2126_v20 = vmul.f32 %v562_v26, %v549_v47  ;;  %v2128_v22 = vmul.f32 %v562_v26, %v550_v23  ;;  %v2130_v57 = vmul.f32 %v562_v26, %v551_v35  ;;  %877 = vrot.lane.b32.xlu1 %v864_v3, %s1689_s25  ;;  %v2142_v35 = vsel %vm912_vm6, %v2001_v14, %v1951_v53 }
 0x104   : > { %812 = vrot.lane.b32.xlu0 %v792_v42, %s1691_s30  ;;  %v918_v49 = vmul.f32 %v2142_v35, %v2051_v25  ;;  %v2152_v23 = vmul.f32 %v2033_v37, %v1174_v30  ;;  %v1025_v53 = vmul.f32 %v1969_v62, %v1006_v1  ;;  %v2161_v3 = vmul.f32 %v567_v46, %v552_v5 }
 0x105   : > { %v2167_v26 = vsel %vm1001_vm7, %v2014_v21, %v1963_v59  ;;  %v686_v5 = vmul.f32 %v2067_v48, %v2091_v16  ;;  %v687_v1 = vmul.f32 %v1929_v41, %v2061_v33  ;;  %v866_v30 = vmul.f32 %v1991_v9, %v2061_v33 }
 0x106   : > { %v937_v58 = vmul.f32 %v1957_v56, %v918_v49  ;;  %v1007_v42 = vmul.f32 %v2167_v26, %v2051_v25  ;;  %v920_v56 = vmul.f32 %v2001_v14, %v2091_v16  ;;  %v774_v25 = vmul.f32 %v2089_v15, %v2091_v16 }
 0x107   : > { %954 = vrot.lane.b32.xlu1 %v936_v50, %s1692_s12  ;;  %v2176_v50 = vmul.f32 %v567_v46, %v553_v45  ;;  %v706_v28 = vmul.f32 %v1954_v54, %v686_v5  ;;  %v707_v46 = vmul.f32 %v1954_v54, %v687_v1  ;;  %v611_v49 = vmul.f32 %v1919_v36, %v2108_v31 }
 0x108   : > { %879 = vrot.lane.b32.xlu0 %v865_v34, %s1689_s25  ;;  %v1026_v59 = vmul.f32 %v1969_v62, %v1007_v42  ;;  %v939_v39 = vmul.f32 %v2010_v19, %v920_v56  ;;  %v794_v47 = vmul.f32 %v1973_v0, %v774_v25  ;;  %v1028_v62 = vmul.f32 %v2023_v27, %v1009_v55  ;;  %v2241_v56 = vpop.permute.xlu1 %634 }
 0x109   : > { %v775_v34 = vmul.f32 %v1935_v44, %v2061_v33  ;;  %v867_v9 = vmul.f32 %v1966_v61, %v2108_v31  ;;  %v921_v45 = vmul.f32 %v2142_v35, %v2061_v33  ;;  %v612_v54 = vmul.f32 %v1919_v36, %v2082_v7 }
 0x10a   : > { %v1010_v5 = vmul.f32 %v2167_v26, %v2061_v33  ;;  %v868_v36 = vmul.f32 %v1966_v61, %v2082_v7  ;;  %v922_v61 = vmul.f32 %v2001_v14, %v2108_v31 }
 0x10b   : > { %1043 = vrot.lane.b32.xlu1 %v1025_v53, %s2523_s16  ;;  %v795_v53 = vmul.f32 %v1973_v0, %v775_v34  ;;  %v940_v42 = vmul.f32 %v2010_v19, %v921_v45  ;;  %v1011_v19 = vmul.f32 %v2014_v21, %v2108_v31 }
 0x10c   : > { %956 = vrot.lane.b32.xlu0 %v937_v58, %s1692_s12  ;;  %v688_v58 = vmul.f32 %v2067_v48, %v2108_v31  ;;  %v1029_v48 = vmul.f32 %v2023_v27, %v1010_v5  ;;  %v1105_v27 = vmul.f32 %v2019_v24, %v2082_v7  ;;  %v942_v55 = vmul.f32 %v1980_v4, %v922_v61 }
 0x10e   : > { %v709_v0 = vmul.f32 %v1933_v43, %v688_v58 }
 0x10f   : > { %632 = vrot.lane.b32.xlu1 %v609_v2, %s2522_s15  ;;  %v1104_v2 = vmul.f32 %v2019_v24, %v2108_v31 }
 0x110   : > { %1045 = vrot.lane.b32.xlu0 %v1026_v59, %s2523_s16  ;;  %v776_v59 = vmul.f32 %v2089_v15, %v2108_v31  ;;  %v777_v15 = vmul.f32 %v1935_v44, %v2082_v7  ;;  %v689_v44 = vmul.f32 %v1929_v41, %v2082_v7 }
 0x112   : > { %v797_v25 = vmul.f32 %v1947_v51, %v776_v59  ;;  %v798_v14 = vmul.f32 %v1947_v51, %v777_v15  ;;  %v1012_v51 = vmul.f32 %v2167_v26, %v2082_v7 }
 0x113   : > { %728 = vrot.lane.b32.xlu1 %v706_v28, %s1690_s22  ;;  %v1031_v28 = vmul.f32 %v2006_v17, %v1011_v19 }
 0x114   : > { %960 = vrot.lane.b32.xlu0 %v939_v39, %s1692_s12  ;;  %v1173_v39 = vmul.f32 %v2053_v38, %v2108_v31  ;;  %v1032_v41 = vmul.f32 %v2006_v17, %v1012_v51  ;;  %v1103_v17 = vmul.f32 0.0, %v2044_v11 }
 0x116   : > { %v1193_v24 = vmul.f32 %v2033_v37, %v1173_v39 }
 0x117   : > { %816 = vrot.lane.b32.xlu1 %v794_v47, %s1691_s30  ;;  %v923_v47 = vmul.f32 %v2142_v35, %v2082_v7 }
 0x118   : > { %1049 = vrot.lane.b32.xlu0 %v1028_v62, %s2523_s16 }
 0x119   : > { %v943_v1 = vmul.f32 %v1980_v4, %v923_v47  ;;  %v1102_v4 = vmul.f32 %v2044_v11, %v2061_v33  ;;  %v1249_v33 = vld [vmem:[%s2503_s5 + $0x8] sm:$0xff] }
 0x11b   : > { %881 = vrot.lane.b32.xlu1 %v866_v30, %s1689_s25  ;;  %v710_v30 = vmul.f32 %v1933_v43, %v689_v44  ;;  %v1101_v43 = vmul.f32 %v2044_v11, %v2091_v16  ;;  %v1168_v16 = vmul.f32 %v2053_v38, %v2041_v6 }
 0x11c   : > { %730 = vrot.lane.b32.xlu0 %v707_v46, %s1690_s22 }
 0x11d   : > { %v1187_v34 = vmul.f32 %v2075_v60, %v1168_v16 }
 0x11f   : > { %636 = vrot.lane.b32.xlu1 %v611_v49, %s2522_s15 }
 0x120   : > { %818 = vrot.lane.b32.xlu0 %v795_v53, %s1691_s30  ;;  %v2249_v21 = vpop.permute.xlu1 %732  ;;  %v1188_v53 = vmul.f32 %v2075_v60, %v2072_v52 }
 0x123   : > { %883 = vrot.lane.b32.xlu1 %v867_v9, %s1689_s25  ;;  %v1189_v9 = vmul.f32 %v2075_v60, %v1987_v8  ;;  %v1275_v8 = vld [vmem:[%s2504_s6] sm:$0xff] }
 0x124   : > { %638 = vrot.lane.b32.xlu0 %v612_v54, %s2522_s15  ;;  %v623_v62 = vpop.permute.xlu1 %622 }
 0x127   : > { %962 = vrot.lane.b32.xlu1 %v940_v42, %s1692_s12 }
 0x128   : > { %734 = vrot.lane.b32.xlu0 %v709_v0, %s1690_s22  ;;  %v721_v35 = vpop.permute.xlu1 %720 }
 0x12b   : > { %1128 = vrot.lane.b32.xlu1 %v1104_v2, %s1694_s29 }
 0x12c   : > { %885 = vrot.lane.b32.xlu0 %v868_v36, %s1689_s25 }
 0x12d   : > { %v2268_v31 = vpop.permute.xlu0 %820 }
 0x12f   : > { %1051 = vrot.lane.b32.xlu1 %v1029_v48, %s2523_s16 }
 0x130   : > { %1055 = vrot.lane.b32.xlu0 %v1031_v28, %s2523_s16 }
 0x131   : > { %v2277_v37 = vpop.permute.xlu0 %628 }
 0x133   : > { %822 = vrot.lane.b32.xlu1 %v797_v25, %s1691_s30 }
 0x134   : > { %1130 = vrot.lane.b32.xlu0 %v1105_v27, %s1694_s29 }
 0x135   : > { %v2290_v7 = vpop.permute.xlu0 %726 }
 0x137   : > { %966 = vrot.lane.b32.xlu1 %v942_v55, %s1692_s12 }
 0x138   : > { %824 = vrot.lane.b32.xlu0 %v798_v14, %s1691_s30 }
 0x139   : > { %v2282_v46 = vpop.permute.xlu1 %970  ;;  %v809_v49 = vpop.permute.xlu0 %808 }
 0x13b   : > { %1217 = vrot.lane.b32.xlu1 %v1193_v24, %s1695_s13 }
 0x13c   : > { %968 = vrot.lane.b32.xlu0 %v943_v1, %s1692_s12  ;;  %s1428_s12 = scalar_lea.sflag [#allocation3], %s377_s24 }
 0x13d   : > { %v2297_v26 = vpop.permute.xlu1 %814 }
 0x13f   : > { %736 = vrot.lane.b32.xlu1 %v710_v30, %s1690_s22 }
 0x140   : > { %1219 = vrot.lane.b32.xlu0 %v2152_v23, %s1695_s13  ;;  %v1248_v23 = vld [vmem:[%s2503_s5] sm:$0xff] }
 0x141   : > { %v2306_v11 = vpop.permute.xlu1 %958 }
 0x143   : > { %1057 = vrot.lane.b32.xlu1 %v1032_v41, %s2523_s16  ;;  %s1505_s16 = sshll.u32 %s377_s24, 3 }
 0x144   : > { %1122 = vrot.lane.b32.xlu0 %v1101_v43, %s1694_s29  ;;  %s379_s25 = scalar_lea.vmem [#allocation2], %s1505_s16 }
 0x145   : > { %s1442_s15 = sshll.u32 %s379_s25, 4  ;;  %s1443_s15 = int_to_ptr.vmem [resolvable:$true] %s1442_s15 }
 0x146   : > { %v2313_v6 = vpop.permute.xlu0 %1059  ;;  %s1613_s0 = scalar_lea.vmem %s1443_s15, 128 }
 0x147   : > { %1124 = vrot.lane.b32.xlu1 %v1102_v4, %s1694_s29  ;;  %p1614_p11 = scmp.ne.s32.totalorder %s1443_s15, %s1613_s0 }
 0x148   : > { %1126 = vrot.lane.b32.xlu0 %v1103_v17, %s1694_s29 }
 0x149   : > { %p1615_p12 = pnand %p1614_p11, %p1795_p5 }
 0x14b   : > { %1253 = vperm.xlu1 %1608, %v1248_v23   ;;  %v2321_v45 = vpop.permute.xlu0 %964  ;;  %p1616_p13 = pneg %p1615_p12 }
 0x14c   : > { %1258 = vperm.xlu0 %1607, %v1249_v33  }
 0x14f   : > { %1205 = vrot.lane.b32.xlu1 %v1187_v34, %s1695_s13 }
 0x150   : > { %1207 = vrot.lane.b32.xlu0 %v1188_v53, %s1695_s13 }
 0x153   : > { %v2316_v38 = vpop.permute.xlu1 %1132  ;;  %1209 = vrot.lane.b32.xlu1 %v1189_v9, %s1695_s13 }
 0x154   : > { %1211 = vrot.lane.b32.xlu0 %v2145_v32, %s1695_s13  ;;  %v1276_v32 = vld [vmem:[%s2504_s6 + $0x8] sm:$0xff] }
 0x157   : > { %1213 = vrot.lane.b32.xlu1 %v2155_v40, %s1695_s13  ;;  %v2328_v52 = vpop.permute.xlu1 %1047 }
 0x158   : > { %1215 = vrot.lane.b32.xlu0 %v1998_v12, %s1695_s13  ;;  %v2332_v60 = vpop.permute.xlu0 %1263  ;;  %s2524_s13 = smov 17  }
 0x15b   : > { %1280 = vperm.xlu1 %1608, %v1275_v8  }
 0x15c   : > { %1285 = vperm.xlu0 %1607, %v1276_v32   ;;  %v2339_v40 = vpop.permute.xlu0 %1053 }
 0x15d   : > { %v2337_v54 = vpop.permute.xlu1 %1221 }
 0x161   : > { %v1121_v58 = vpop.permute.xlu1 %1120 }
 0x165   : > { %v2341_v42 = vpop.permute.xlu0 %1290  ;;  %v1117_v0 = vpop.permute.xlu1 %1116 }
 0x169   : > { %v625_v2 = vpop.permute.xlu0 %624  ;;  %v627_v5 = vpop.permute.xlu1 %626 }
 0x16a   : > { %v641_v12 = vsel %vm640_vm4, %v623_v62, %v625_v2  ;;  %v642_v36 = vsel %vm640_vm4, %v625_v2, %v627_v5  ;;  %v658_v19 = vadd.f32 %v627_v5, %v2130_v57 }
 0x16b   : > { %v656_v48 = vadd.f32 %v641_v12, %v2126_v20  ;;  %v657_v59 = vadd.f32 %v642_v36, %v2128_v22 }
 0x16d   : > { %v876_v28 = vpop.permute.xlu0 %875  ;;  %v723_v25 = vpop.permute.xlu1 %722 }
 0x16e   : > { %v739_v61 = vsel %vm738_vm8, %v721_v35, %v723_v25 }
 0x16f   : > { %v754_v27 = vadd.f32 %v739_v61, %v656_v48 }
 0x171   : > { %v1119_v15 = vpop.permute.xlu0 %1118  ;;  %v811_v39 = vpop.permute.xlu1 %810 }
 0x172   : > { %v1135_v55 = vsel %vm1134_vm9, %v1117_v0, %v1119_v15  ;;  %v1136_v14 = vsel %vm1134_vm9, %v1119_v15, %v1121_v58  ;;  %v827_v57 = vsel %vm826_vm10, %v809_v49, %v811_v39 }
 0x173   : > { %v842_v47 = vadd.f32 %v827_v57, %v754_v27 }
 0x175   : > { %v878_v20 = vpop.permute.xlu1 %877  ;;  %v631_v62 = vpop.permute.xlu0 %630  ;;  %v899_v22 = vadd.f32 %v876_v28, %v842_v47 }
 0x176   : > { %v887_v24 = vsel %vm544_vm5, %v876_v28, %v878_v20  ;;  %v643_v44 = vsel %vm640_vm4, %v2277_v37, %v631_v62 }
 0x177   : > { %v659_v1 = vadd.f32 %v643_v44, %v2158_v63 }
 0x179   : > { %v955_v30 = vpop.permute.xlu1 %954  ;;  %v725_v51 = vpop.permute.xlu0 %724 }
 0x17a   : > { %v988_v35 = vadd.f32 %v955_v30, %v899_v22  ;;  %v740_v41 = vsel %vm738_vm8, %v723_v25, %v725_v51  ;;  %v756_v43 = vadd.f32 %v725_v51, %v658_v19 }
 0x17b   : > { %v755_v4 = vadd.f32 %v740_v41, %v657_v59 }
 0x17d   : > { %v1044_v17 = vpop.permute.xlu1 %1043  ;;  %v813_v23 = vpop.permute.xlu0 %812 }
 0x17e   : > { %v1077_v16 = vadd.f32 %v1044_v17, %v988_v35  ;;  %v828_v33 = vsel %vm826_vm10, %v811_v39, %v813_v23  ;;  %v844_v34 = vadd.f32 %v813_v23, %v756_v43 }
 0x17f   : > { %v843_v49 = vadd.f32 %v828_v33, %v755_v4 }
 0x180   : > { %v901_v53 = vadd.f32 %v878_v20, %v844_v34  ;;  %v2358_v9 = vadd.f32 %v1117_v0, %v1077_v16 }
 0x181   : > { %v880_v37 = vpop.permute.xlu0 %879  ;;  %v633_v8 = vpop.permute.xlu1 %632  ;;  %v900_v63 = vadd.f32 %v887_v24, %v843_v49 }
 0x182   : > { %v644_v32 = vsel %vm640_vm4, %v631_v62, %v633_v8  ;;  %v661_v58 = vadd.f32 %v633_v8, %v2176_v50 }
 0x183   : > { %v660_v2 = vadd.f32 %v644_v32, %v2161_v3 }
 0x185   : > { %v957_v5 = vpop.permute.xlu0 %956  ;;  %v729_v12 = vpop.permute.xlu1 %728 }
 0x186   : > { %v973_v36 = vsel %vm972_vm11, %v955_v30, %v957_v5  ;;  %v974_v19 = vsel %vm972_vm11, %v957_v5, %v2306_v11  ;;  %v741_v0 = vsel %vm738_vm8, %v2290_v7, %v729_v12 }
 0x187   : > { %v989_v48 = vadd.f32 %v973_v36, %v900_v63  ;;  %v990_v59 = vadd.f32 %v974_v19, %v901_v53  ;;  %v757_v28 = vadd.f32 %v741_v0, %v659_v1 }
 0x189   : > { %v1046_v25 = vpop.permute.xlu0 %1045  ;;  %v817_v61 = vpop.permute.xlu1 %816 }
 0x18a   : > { %v1062_v50 = vsel %vm1061_vm12, %v1044_v17, %v1046_v25  ;;  %v1063_v3 = vsel %vm1061_vm12, %v1046_v25, %v2328_v52  ;;  %v829_v27 = vsel %vm826_vm10, %v2297_v26, %v817_v61 }
 0x18b   : > { %v1078_v15 = vadd.f32 %v1062_v50, %v989_v48  ;;  %v1079_v39 = vadd.f32 %v1063_v3, %v990_v59  ;;  %v845_v11 = vadd.f32 %v829_v27, %v757_v28 }
 0x18d   : > { %v961_v57 = vpop.permute.xlu0 %960  ;;  %v902_v47 = vadd.f32 %v880_v37, %v845_v11  ;;  %v882_v7 = vpop.permute.xlu1 %881  ;;  %v2373_v20 = vadd.f32 %v1135_v55, %v1078_v15  ;;  %v2375_v62 = vadd.f32 %v1136_v14, %v1079_v39 }
 0x18e   : > { %v888_v17 = vsel %vm544_vm5, %v880_v37, %v882_v7 }
 0x18f   : > { %v991_v22 = vadd.f32 %v961_v57, %v902_v47 }
 0x191   : > { %v2377_v24 = vpop.permute.xlu0 %1049  ;;  %v637_v44 = vpop.permute.xlu1 %636 }
 0x192   : > { %v2380_v1 = vadd.f32 %v2377_v24, %v991_v22  ;;  %v645_v8 = vsel %vm640_vm4, %v2241_v56, %v637_v44 }
 0x195   : > { %v731_v52 = vpop.permute.xlu0 %730  ;;  %v884_v30 = vpop.permute.xlu1 %883 }
 0x196   : > { %v742_v26 = vsel %vm738_vm8, %v729_v12, %v731_v52  ;;  %v759_v35 = vadd.f32 %v731_v52, %v661_v58  ;;  %v662_v12 = vadd.f32 %v645_v8, %v2169_v18 }
 0x197   : > { %v758_v51 = vadd.f32 %v742_v26, %v660_v2 }
 0x199   : > { %v819_v41 = vpop.permute.xlu0 %818  ;;  %v963_v43 = vpop.permute.xlu1 %962 }
 0x19a   : > { %v830_v55 = vsel %vm826_vm10, %v817_v61, %v819_v41  ;;  %v847_v4 = vadd.f32 %v819_v41, %v759_v35  ;;  %v975_v49 = vsel %vm972_vm11, %v961_v57, %v963_v43  ;;  %v976_v63 = vsel %vm972_vm11, %v963_v43, %v2321_v45 }
 0x19b   : > { %v846_v14 = vadd.f32 %v830_v55, %v758_v51 }
 0x19c   : > { %v904_v23 = vadd.f32 %v882_v7, %v847_v4 }
 0x19d   : > { %v903_v16 = vadd.f32 %v888_v17, %v846_v14  ;;  %v1129_v33 = vpop.permute.xlu1 %1128  ;;  %v639_v34 = vpop.permute.xlu0 %638 }
 0x19e   : > { %v993_v32 = vadd.f32 %v976_v63, %v904_v23  ;;  %v664_v18 = vadd.f32 %v639_v34, %v2100_v29 }
 0x19f   : > { %v2386_v53 = vadd.f32 %v975_v49, %v903_v16 }
 0x1a1   : > { %v2392_v58 = vpop.permute.xlu1 %1051  ;;  %v735_v2 = vpop.permute.xlu0 %734 }
 0x1a2   : > { %v1065_v37 = vsel %vm1061_vm12, %v2392_v58, %v2339_v40  ;;  %v743_v5 = vsel %vm738_vm8, %v2249_v21, %v735_v2  ;;  %v646_v21 = vsel %vm640_vm4, %v637_v44, %v639_v34 }
 0x1a3   : > { %v2400_v36 = vadd.f32 %v1065_v37, %v993_v32  ;;  %v760_v19 = vadd.f32 %v743_v5, %v662_v12  ;;  %v663_v15 = vadd.f32 %v646_v21, %v2171_v10 }
 0x1a5   : > { %v823_v56 = vpop.permute.xlu1 %822  ;;  %v886_v0 = vpop.permute.xlu0 %885 }
 0x1a6   : > { %v831_v45 = vsel %vm826_vm10, %v2268_v31, %v823_v56  ;;  %v889_v29 = vsel %vm544_vm5, %v884_v30, %v886_v0 }
 0x1a7   : > { %v848_v48 = vadd.f32 %v831_v45, %v760_v19 }
 0x1a9   : > { %v967_v59 = vpop.permute.xlu1 %966  ;;  %v905_v28 = vadd.f32 %v884_v30, %v848_v48  ;;  %v1056_v25 = vpop.permute.xlu0 %1055 }
 0x1ab   : > { %v994_v61 = vadd.f32 %v967_v59, %v905_v28 }
 0x1ad   : > { %v1083_v50 = vadd.f32 %v1056_v25, %v994_v61  ;;  %v1218_v40 = vpop.permute.xlu1 %1217  ;;  %v1131_v3 = vpop.permute.xlu0 %1130 }
 0x1ae   : > { %v1140_v32 = vsel %vm1134_vm9, %v1131_v3, %v2316_v38 }
 0x1af   : > { %v1156_v27 = vadd.f32 %v1129_v33, %v1083_v50 }
 0x1b1   : > { %v1245_v39 = vadd.f32 %v1218_v40, %v1156_v27  ;;  %v737_v11 = vpop.permute.xlu1 %736  ;;  %v825_v57 = vpop.permute.xlu0 %824 }
 0x1b2   : > { %v744_v31 = vsel %vm738_vm8, %v735_v2, %v737_v11  ;;  %v762_v47 = vadd.f32 %v737_v11, %v664_v18  ;;  %v832_v52 = vsel %vm826_vm10, %v823_v56, %v825_v57 }
 0x1b3   : > { %v1272_v7 = vmul.f32 %v2332_v60, %v1245_v39  ;;  %v761_v22 = vadd.f32 %v744_v31, %v663_v15 }
 0x1b4   : > { %v850_v26 = vadd.f32 %v825_v57, %v762_v47 }
 0x1b5   : > { %v1299_v51 = vadd.f32 %v2341_v42, %v1272_v7  ;;  %v849_v44 = vadd.f32 %v832_v52, %v761_v22  ;;  %v969_v35 = vpop.permute.xlu0 %968  ;;  %v1058_v10 = vpop.permute.xlu1 %1057 }
 0x1b6   : > { %v907_v41 = vadd.f32 %v886_v0, %v850_v26  ;;  %v978_v4 = vsel %vm972_vm11, %v969_v35, %v2282_v46  ;;  %v977_v14 = vsel %vm972_vm11, %v967_v59, %v969_v35  ;;  %v1067_v16 = vsel %vm1061_vm12, %v1058_v10, %v2313_v6 }
 0x1b7   : > { %v1308_v43 = vmax.f32 %v1299_v51, 0.0  ;;  %v906_v55 = vadd.f32 %v889_v29, %v849_v44  ;;  %v1066_v8 = vsel %vm1061_vm12, %v1056_v25, %v1058_v10  ;;  %v1139_v46 = vsel %vm1134_vm9, %v1129_v33, %v1131_v3 }
 0x1b8   : > { %v996_v17 = vadd.f32 %v978_v4, %v907_v41 }
 0x1b9   : > { %v1317_v23 = vmin.f32 %v1308_v43, 6.0  ;;  %v995_v34 = vadd.f32 %v977_v14, %v906_v55  ;;  %v1220_v49 = vpop.permute.xlu0 %1219  ;;  %v1125_v38 = vpop.permute.xlu1 %1124 }
 0x1ba   : > { %v1085_v63 = vadd.f32 %v1067_v16, %v996_v17  ;;  %v1229_v12 = vsel %vm1223_vm13, %v1220_v49, %v2337_v54  ;;  %v1228_v6 = vsel %vm1223_vm13, %v1218_v40, %v1220_v49 }
 0x1bb   : > { %v1324_v30 = vpack.c.bf16 %v1317_v23, %v1317_v23  ;;  %v1084_v2 = vadd.f32 %v1066_v8, %v995_v34 }
 0x1bc   : > { %v1158_v37 = vadd.f32 %v1140_v32, %v1085_v63 }
 0x1bd   : > { %v1157_v5 = vadd.f32 %v1139_v46, %v1084_v2  ;;  %1339 = vrot.lane.b32.xlu1 %v1324_v30, %s2524_s13  ;;  %v1123_v0 = vpop.permute.xlu0 %1122 }
 0x1be   : > { %v1247_v19 = vadd.f32 %v1229_v12, %v1158_v37  ;;  %v1137_v11 = vsel %vm1134_vm9, %v1123_v0, %v1125_v38  ;;  %v1153_v26 = vadd.f32 %v1123_v0, %v2380_v1 }
 0x1bf   : > { %v1246_v56 = vadd.f32 %v1228_v6, %v1157_v5 }
 0x1c0   : > { %v1274_v45 = vmul.f32 %v2332_v60, %v1247_v19 }
 0x1c1   : > { %v1273_v48 = vmul.f32 %v2332_v60, %v1246_v56  ;;  %v1127_v61 = vpop.permute.xlu0 %1126  ;;  %v1064_v60 = vsel %vm1061_vm12, %v2377_v24, %v2392_v58 }
 0x1c2   : > { %v1301_v59 = vadd.f32 %v2341_v42, %v1274_v45  ;;  %v1081_v31 = vadd.f32 %v1064_v60, %v2386_v53  ;;  %v1138_v58 = vsel %vm1134_vm9, %v1125_v38, %v1127_v61 }
 0x1c3   : > { %v1300_v33 = vadd.f32 %v2341_v42, %v1273_v48  ;;  %v1155_v41 = vadd.f32 %v1138_v58, %v2400_v36 }
 0x1c4   : > { %v1310_v28 = vmax.f32 %v1301_v59, 0.0  ;;  %v1154_v24 = vadd.f32 %v1137_v11, %v1081_v31  ;;  %v1404_v59 = vld [vmem:[%s2506_s8] sm:$0xf] }
 0x1c5   : > { %v1309_v25 = vmax.f32 %v1300_v33, 0.0  ;;  %v1412_v33 = vld [vmem:[%s2507_s9] sm:$0xf] }
 0x1c6   : > { %v1319_v54 = vmin.f32 %v1310_v28, 6.0  ;;  %v1254_v50 = vpop.permute.xlu1 %1253 }
 0x1c7   : > { %v1318_v3 = vmin.f32 %v1309_v25, 6.0  ;;  %v1259_v40 = vpop.permute.xlu0 %1258 }
 0x1c8   : > { %v1326_v21 = vpack.c.bf16 %v1319_v54, %v1319_v54 }
 0x1c9   : > { %v1325_v27 = vpack.c.bf16 %v1318_v3, %v1318_v3 }
 0x1ca   : > { %v1206_v18 = vpop.permute.xlu1 %1205  ;;  %1343 = vrot.lane.b32.xlu1 %v1326_v21, %s2524_s13 }
 0x1cb   : > { %1341 = vrot.lane.b32.xlu0 %v1325_v27, %s2524_s13  ;;  %v1208_v15 = vpop.permute.xlu0 %1207  ;;  %v1239_v47 = vadd.f32 %v1206_v18, %v2358_v9 }
 0x1cc   : > { %v1224_v42 = vsel %vm1223_vm13, %v1206_v18, %v1208_v15 }
 0x1cd   : > { %v1240_v7 = vadd.f32 %v1224_v42, %v2373_v20  ;;  %v1266_v53 = vmul.f32 %v1254_v50, %v1239_v47 }
 0x1ce   : > { %v1210_v39 = vpop.permute.xlu1 %1209 }
 0x1cf   : > { %v1225_v57 = vsel %vm1223_vm13, %v1208_v15, %v1210_v39  ;;  %v1212_v52 = vpop.permute.xlu0 %1211  ;;  %v1267_v10 = vmul.f32 %v1254_v50, %v1240_v7  ;;  %v1320_v15 = vld [vmem:[%s2505_s7] sm:$0x3] }
 0x1d0   : > { %v1241_v22 = vadd.f32 %v1225_v57, %v2375_v62  ;;  %v1242_v35 = vadd.f32 %v1212_v52, %v1153_v26 }
 0x1d2   : > { %v1214_v51 = vpop.permute.xlu1 %1213  ;;  %v1268_v9 = vmul.f32 %v1254_v50, %v1241_v22  ;;  %v1269_v23 = vmul.f32 %v1259_v40, %v1242_v35 }
 0x1d3   : > { %v1226_v44 = vsel %vm1223_vm13, %v1212_v52, %v1214_v51  ;;  %v1216_v43 = vpop.permute.xlu0 %1215 }
 0x1d4   : > { %v1243_v29 = vadd.f32 %v1226_v44, %v1154_v24  ;;  %v1227_v62 = vsel %vm1223_vm13, %v1214_v51, %v1216_v43  ;;  %v1612_v24 = vld [vmem:[%s1836_s14] sm:$0xff] }
 0x1d5   : > { %v1244_v4 = vadd.f32 %v1227_v62, %v1155_v41 }
 0x1d6   : > { %v1270_v20 = vmul.f32 %v1259_v40, %v1243_v29  ;;  %v1281_v55 = vpop.permute.xlu1 %1280 }
 0x1d7   : > { %v1293_v1 = vadd.f32 %v1281_v55, %v1266_v53  ;;  %v1294_v14 = vadd.f32 %v1281_v55, %v1267_v10  ;;  %v1295_v17 = vadd.f32 %v1281_v55, %v1268_v9  ;;  %v1271_v16 = vmul.f32 %v1259_v40, %v1244_v4  ;;  %v1286_v8 = vpop.permute.xlu0 %1285 }
 0x1d8   : > { %v1296_v63 = vadd.f32 %v1286_v8, %v1269_v23  ;;  %v1297_v30 = vadd.f32 %v1286_v8, %v1270_v20 }
 0x1d9   : > { %v1302_v34 = vmax.f32 %v1293_v1, 0.0  ;;  %v1303_v49 = vmax.f32 %v1294_v14, 0.0  ;;  %v1304_v36 = vmax.f32 %v1295_v17, 0.0  ;;  %v1298_v32 = vadd.f32 %v1286_v8, %v1271_v16 }
 0x1da   : > { %v1305_v37 = vmax.f32 %v1296_v63, 0.0  ;;  %v1306_v5 = vmax.f32 %v1297_v30, 0.0 }
 0x1db   : > { %v1311_v2 = vmin.f32 %v1302_v34, 6.0  ;;  %v1312_v46 = vmin.f32 %v1303_v49, 6.0  ;;  %v1307_v12 = vmax.f32 %v1298_v32, 0.0  ;;  %v1313_v56 = vmin.f32 %v1304_v36, 6.0 }
 0x1dc   : > { %v1314_v6 = vmin.f32 %v1305_v37, 6.0  ;;  %v1315_v19 = vmin.f32 %v1306_v5, 6.0 }
 0x1dd   : > { %v1316_v0 = vmin.f32 %v1307_v12, 6.0 }
 0x1de   : > { %v1321_v45 = vpack.c.bf16 %v1314_v6, %v1311_v2  ;;  %v1322_v48 = vpack.c.bf16 %v1315_v19, %v1312_v46 }
 0x1df   : > { %v1323_v38 = vpack.c.bf16 %v1316_v0, %v1313_v56 }
 0x1e0   : > { %1335 = vrot.lane.b32.xlu0 %v1322_v48, %s2524_s13 }
 0x1e1   : > { %1337 = vrot.lane.b32.xlu1 %v1323_v38, %s2524_s13 }
 0x1e4   : > { %1333 = vrot.lane.b32.xlu0 %v1321_v45, %s2524_s13  ;;  %s1522_s13 = sshll.u32 %s1778_s21, 7  ;;  %s1696_s21 = smov [#allocation2]  }
 0x1e5   : > { %1407 = vperm.xlu1 %1608, %v1404_v59   ;;  %s1440_s29 = scalar_lea.hbm %s2509_s11, %s1522_s13  ;;  %s1617_s16 = sshll.u32 %s1696_s21, 4  ;;  %s1618_s16 = int_to_ptr.vmem [resolvable:$false] %s1617_s16 }
 0x1e6   : > { %s1619_s14 = scalar_lea.vmem %s1618_s16, 256  ;;  %p1620_p0 = scmp.lt.s32.totalorder %s1443_s15, %s1618_s16 }
 0x1e7   : > { %p1621_p1 = scmp.lt.s32.totalorder %s1619_s14, %s1613_s0 }
 0x1e8   : > { %1415 = vperm.xlu0 %1607, %v1412_v33  }
 0x1e9   : > { %p1622_p2 = por %p1621_p1, %p1620_p0 }
 0x1eb   : > { %p1623_p3 = pnand %p1622_p2, %p1616_p13 }
 0x22f   : > { %v1340_v28 = vpop.permute.xlu1 %1339 }
 0x23c   : > { %v1344_v25 = vpop.permute.xlu1 %1343 }
 0x23d   : > { %v1342_v61 = vpop.permute.xlu0 %1341 }
 0x23e   : > { %v1349_v54 = vsel %vm1163_vm2, %v1342_v61, %v1344_v25  ;;  %v1348_v50 = vsel %vm1163_vm2, %v1340_v28, %v1342_v61 }
 0x23f   : > { %1514 = vmatprep.subr.msk.bf16.mxu1 %vm1356_vm14, %v1349_v54  ;;  %v1358_v3 = vsel %vm1356_vm14, %v1348_v50, 0 }
 0x240   : > { %1376 = vmatpush1.bf16.msra.mxu1 %v1358_v3 }
 0x252   : > { %v1336_v21 = vpop.permute.xlu0 %1335 }
 0x253   : > { %v1338_v40 = vpop.permute.xlu1 %1337 }
 0x254   : > { %v1347_v27 = vsel %vm1163_vm2, %v1336_v21, %v1338_v40 }
 0x255   : > { %1377 = vmatprep.subr.bf16.mxu1 %v1347_v27 }
 0x256   : > { %v1334_v18 = vpop.permute.xlu0 %1333 }
 0x257   : > { %v1346_v60 = vsel %vm1163_vm2, %v1334_v18, %v1336_v21 }
 0x258   : > { %1378 = vmatpush1.bf16.msra.mxu1 %v1346_v60 }
 0x25b   : > { %1515 = vmatmul.mubr.msk.bf16.vlgmr.msra.gmra.mxu1 %vm1352_vm15, %v1320_v15 }
 0x260   : > { %v1408_v42 = vpop.permute.xlu1 %1407 }
 0x263   : > { %v1416_v57 = vpop.permute.xlu0 %1415 }
 0x31b   : > { %v1397_v39 = vpop.f32.mrf.mxu1 }
 0x31c   : > { %v1410_v11 = vmul.f32 %v1408_v42, %v1397_v39 }
 0x31d   : > { %v1399_v31 = vpop.f32.mrf.mxu1 }
 0x31e   : > { %v1418_v47 = vadd.f32 %v1416_v57, %v1410_v11  ;;  %v1411_v7 = vmul.f32 %v1408_v42, %v1399_v31 }
 0x31f   : > { %v1401_v22 = vpop.f32.mrf.mxu1 }
 0x320   : > { %v1419_v52 = vadd.f32 %v1416_v57, %v1411_v7  ;;  %v1420_v58 = vadd.f32 %v1612_v24, %v1418_v47 }
 0x321   : > { %v1402_v26 = vpop.f32.mrf.mxu1 }
 0x322   : > { %v1421_v51 = vadd.f32 %v1419_v52, %v1842_v13 }
 0x324   : > { %v1424_v44 = vcombine.low %v1420_v58, %v1421_v51 }
 0x326   : > { %1426 = vst [vmem:[%s379_s25] sm:$0xff] %v1424_v44 }
 0x327   : > { %1626 = shalt.err (!%p1623_p3)
}
 0x328   : > { %s1627_s1 = scalar_lea.hbm %s1440_s29, 128  ;;  %s1631_s25 = scalar_lea.hbm %s2509_s11, 256 }
 0x329   : > { %p1628_p4 = scmp.ne.s32.totalorder %s1440_s29, %s1627_s1  ;;  %p1632_p9 = scmp.lt.s32.totalorder %s1440_s29, %s2509_s11 }
 0x32a   : > { %p1633_p10 = scmp.lt.s32.totalorder %s1631_s25, %s1627_s1 }
 0x32b   : > { %p1629_p7 = pnand %p1628_p4, %p1795_p5 }
 0x32c   : > { %p1634_p11 = por %p1633_p10, %p1632_p9 }
 0x32d   : > { %p1630_p8 = pneg %p1629_p7 }
 0x32f   : > { %p1635_p12 = pnand %p1634_p11, %p1630_p8 }
 0x331   : > { %1638 = shalt.err (!%p1635_p12)
}
 0x332   : > { %1523 = dma.vmem_to_hbm [thread:$0]  (%p1795_p5), %s1443_s15, 128, %s1440_s29, %s1428_s12  }
 0x333 PF: > { %p1529_p13 = scmp.ge.s32.totalorder %s1673_s20, 2  ;;  %s1454_s0 = sand.u32 1, %s1661_s17  }
 0x334   : > { %s1455_s21 = scalar_lea.sflag [#allocation3], %s1454_s0 }
 0x335   : > { %p1526_p0 = pnand %p1529_p13, %p1799_p6 }
 0x337   : > { %p1527_p1 = pneg %p1526_p0 }
 0x339   : > { %1656 = dma.done.wait (%p1527_p1), %s1455_s21, 128  }
 0x33a   : > { %1658 = vsyncadd (%p1527_p1), %s1455_s21, 4294967168  ;;  %p21_p2 = scmp.ge.s32.totalorder %s1782_s23, 4   ;;  %s2525_s17 = smov %s1665_s18 }
 0x33b   : > { %s2526_s18 = smov %s1669_s19  ;;  %s2527_s19 = smov %s1793_s26 }
 0x33c   : > { %s2528_s20 = smov %s1782_s23  ;;  %23 = sbr.rel (!%p21_p2) target bundleno = 6 (0x6), region = 100 }
 0x341   :  { %1460 = vsyncpa [#allocation3], 1 }
 0x342   :  { %1462 = vsyncpa [#allocation3 + $0x1], 1 }

</bundles_post_ra>
